<compile_context>
chip_gen: v7x
topology: tpu7x:2x2x1
jax: 0.10.0
libtpu: 0.0.40
codegen_flags: <defaults>
</compile_context>

<pallas_src>
import jax
import jax.numpy as jnp
from jax import lax
from jax.experimental import pallas as pl
from jax.experimental.pallas import tpu as pltpu

BN_EPS = 1e-5                        # nn.BatchNorm2d default eps
LANE_TILE_CAP = 16384                # hard cap on lane-tile width
CONV_VMEM_BUDGET = 6 * 1024 * 1024   # per-step VMEM budget (double-buffered) for pass 1
ROWPASS_VMEM_BUDGET = 6 * 1024 * 1024
POOL_TILE_BYTES = 2 * 1024 * 1024    # per-buffer budget for the fused BN+pool pass


# --------------------------------------------------------------------------
# tiling helpers
# --------------------------------------------------------------------------
def _pick_tile(total, target, align):
    """Largest divisor of `total` that is a multiple of `align` and <= target.
    Falls back to `total` (a full-extent block is always legal)."""
    if total <= target:
        return total
    t = (min(total, target) // align) * align
    while t >= align:
        if total % t == 0:
            return t
        t -= align
    return total


def _conv_tile_r(R, K, Co, y_bytes):
    """Lane tile for the conv+stats pass: bf16 (K, TR) input block + (Co, TR)
    output block, both double-buffered, within CONV_VMEM_BUDGET."""
    per_lane = 2 * (2 * K + y_bytes * Co)
    target = min(LANE_TILE_CAP, max(128, CONV_VMEM_BUDGET // max(per_lane, 1)))
    return _pick_tile(R, target, 128)


def _rowpass_tile_r(R, Co, in_bytes, out_bytes):
    """Lane tile for the elementwise BN+ReLU pass over a (Co, R) array."""
    per_lane = 2 * Co * (in_bytes + out_bytes)
    target = min(LANE_TILE_CAP, max(128, ROWPASS_VMEM_BUDGET // max(per_lane, 1)))
    return _pick_tile(R, target, 128)


# --------------------------------------------------------------------------
# Kernels
# --------------------------------------------------------------------------
def _conv_stats_kernel(w_ref, xcol_ref, b_ref, y_ref, sum_ref, sq_ref):
    """Folded 3x3 conv for one lane tile: (Co, 9*Ci) @ (9*Ci, TR) on the MXU
    (bf16 multiplies, f32 accumulation) + bias, plus per-tile BN partial sums."""
    y = jnp.dot(w_ref[...], xcol_ref[...], preferred_element_type=jnp.float32)
    y = y + b_ref[...]
    y_ref[...] = y.astype(y_ref.dtype)                   # bf16 (layer 1) or f32 (layer 2)
    sum_ref[0] = jnp.sum(y, axis=1, keepdims=True)       # (Co, 1) partial sum
    sq_ref[0] = jnp.sum(y * y, axis=1, keepdims=True)    # (Co, 1) partial sum of squares


def _bn_relu_kernel(y_ref, scale_ref, shift_ref, x_ref):
    """y*scale + shift, ReLU; per-channel (Co,1) scale/shift broadcast over lanes.
    Computes in f32, writes in the output dtype (bf16 for the conv2 feed)."""
    y = y_ref[...].astype(jnp.float32)
    x = jnp.maximum(y * scale_ref[...] + shift_ref[...], 0.0)
    x_ref[...] = x.astype(x_ref.dtype)


def _bn_relu_pool_kernel(y_ref, scale_ref, shift_ref, sel_ref, x_ref, p_ref):
    """BN affine + ReLU fused with the 2x2 max-pool.

    Block rows correspond to (c, n, h//2); the 2*W lanes hold the pair of image
    rows [2*h2 | 2*h2+1].  The 4 window positions are gathered with one-hot
    selection matmuls and max-reduced -- no lane-strided ops."""
    x = jnp.maximum(y_ref[...].astype(jnp.float32) * scale_ref[...] + shift_ref[...], 0.0)
    x_ref[...] = x
    p = jnp.dot(x, sel_ref[0], preferred_element_type=jnp.float32)
    for t in range(1, 4):
        p = jnp.maximum(p, jnp.dot(x, sel_ref[t], preferred_element_type=jnp.float32))
    p_ref[...] = p


# --------------------------------------------------------------------------
# pallas_call wrappers
# --------------------------------------------------------------------------
def _conv3x3_stats_call(w_t, xcol_t, bias_c, tile_r, y_dtype):
    Co, K = w_t.shape
    R = xcol_t.shape[1]
    n_tiles = R // tile_r
    return pl.pallas_call(
        _conv_stats_kernel,
        out_shape=(
            jax.ShapeDtypeStruct((Co, R), y_dtype),
            jax.ShapeDtypeStruct((n_tiles, Co, 1), jnp.float32),
            jax.ShapeDtypeStruct((n_tiles, Co, 1), jnp.float32),
        ),
        grid=(n_tiles,),
        in_specs=[
            pl.BlockSpec((Co, K), lambda j: (0, 0)),
            pl.BlockSpec((K, tile_r), lambda j: (0, j)),
            pl.BlockSpec((Co, 1), lambda j: (0, 0)),
        ],
        out_specs=(
            pl.BlockSpec((Co, tile_r), lambda j: (0, j)),
            pl.BlockSpec((1, Co, 1), lambda j: (j, 0, 0)),
            pl.BlockSpec((1, Co, 1), lambda j: (j, 0, 0)),
        ),
        compiler_params=pltpu.CompilerParams(dimension_semantics=("parallel",)),
    )(w_t, xcol_t, bias_c)


def _bn_relu_call(y, scale_c, shift_c, tile_r, out_dtype):
    Co, R = y.shape
    n_tiles = R // tile_r
    return pl.pallas_call(
        _bn_relu_kernel,
        out_shape=jax.ShapeDtypeStruct((Co, R), out_dtype),
        grid=(n_tiles,),
        in_specs=[
            pl.BlockSpec((Co, tile_r), lambda j: (0, j)),
            pl.BlockSpec((Co, 1), lambda j: (0, 0)),
            pl.BlockSpec((Co, 1), lambda j: (0, 0)),
        ],
        out_specs=pl.BlockSpec((Co, tile_r), lambda j: (0, j)),
        compiler_params=pltpu.CompilerParams(dimension_semantics=("parallel",)),
    )(y, scale_c, shift_c)


def _bn_relu_pool_call(y_rows, scale_rows, shift_rows, sel, tile_rows):
    Rv, Cv = y_rows.shape
    W2 = sel.shape[-1]
    n_tiles = Rv // tile_rows
    return pl.pallas_call(
        _bn_relu_pool_kernel,
        out_shape=(
            jax.ShapeDtypeStruct((Rv, Cv), jnp.float32),
            jax.ShapeDtypeStruct((Rv, W2), jnp.float32),
        ),
        grid=(n_tiles,),
        in_specs=[
            pl.BlockSpec((tile_rows, Cv), lambda j: (j, 0)),
            pl.BlockSpec((tile_rows, 1), lambda j: (j, 0)),
            pl.BlockSpec((tile_rows, 1), lambda j: (j, 0)),
            pl.BlockSpec((4, Cv, W2), lambda j: (0, 0, 0)),
        ],
        out_specs=(
            pl.BlockSpec((tile_rows, Cv), lambda j: (j, 0)),
            pl.BlockSpec((tile_rows, W2), lambda j: (j, 0)),
        ),
        compiler_params=pltpu.CompilerParams(dimension_semantics=("parallel",)),
    )(y_rows, scale_rows, shift_rows, sel)


# --------------------------------------------------------------------------
# Plain-JAX glue
# --------------------------------------------------------------------------
def _im2col_cr(x_cnhw):
    """(C, N, H, W) -> (9*C, N*H*W) folded im2col for a 3x3 / padding=1 conv.
    Taps ordered (dy, dx)-major, channel-minor (matches the weight reshape)."""
    C, N, H, W = x_cnhw.shape
    xp = jnp.pad(x_cnhw, ((0, 0), (0, 0), (1, 1), (1, 1)))
    taps = [xp[:, :, dy:dy + H, dx:dx + W] for dy in range(3) for dx in range(3)]
    return jnp.stack(taps, axis=0).reshape(9 * C, N * H * W)


def _pool_selectors(W):
    """(4, 2*W, W//2) one-hot gather matrices for the 4 positions of a 2x2 window."""
    W2 = W // 2
    col = jnp.arange(2 * W)[None, :, None]
    w2 = jnp.arange(W2)[None, None, :]
    hh = jnp.array([0, 0, 1, 1]).reshape(4, 1, 1)
    ww = jnp.array([0, 1, 0, 1]).reshape(4, 1, 1)
    return (col == hh * W + 2 * w2 + ww).astype(jnp.float32)


def _conv_layer_stats(x_cnhw, w_oihw, conv_b, bn_g, bn_b, y_dtype):
    """Conv2d(3x3, pad=1) in the CR layout + training-mode BatchNorm statistics.
    Returns pre-BN activations y (Co, N*H*W) in `y_dtype` and BN scale / shift."""
    C, N, H, W = x_cnhw.shape
    Co = w_oihw.shape[0]
    R = N * H * W
    K = 9 * C
    tile_r = _conv_tile_r(R, K, Co, jnp.dtype(y_dtype).itemsize)

    xcol = _im2col_cr(x_cnhw.astype(jnp.bfloat16))                            # (9C, R) bf16
    w_t = jnp.transpose(w_oihw, (0, 2, 3, 1)).reshape(Co, K).astype(jnp.bfloat16)
    b_c = conv_b.reshape(Co, 1).astype(jnp.float32)

    y, s, ss = _conv3x3_stats_call(w_t, xcol, b_c, tile_r, y_dtype)

    mean = jnp.sum(s, axis=0)[:, 0] / R
    var = jnp.maximum(jnp.sum(ss, axis=0)[:, 0] / R - mean * mean, 0.0)        # biased var
    scale = bn_g.astype(jnp.float32) * lax.rsqrt(var + BN_EPS)
    shift = bn_b.astype(jnp.float32) - mean * scale
    return y, scale, shift


@jax.jit
def encoder_block_forward(x_nchw, params):
    """Pallas-backed encoder_block.forward: returns (x, p) in NCHW like PyTorch."""
    N, Ci, H, W = x_nchw.shape
    Co = params["w1"].shape[0]
    assert H % 2 == 0 and W % 2 == 0, "MaxPool2d(2,2) path assumes even H, W"
    H2, W2 = H // 2, W // 2
    R = N * H * W

    x_c = jnp.transpose(x_nchw, (1, 0, 2, 3)).astype(jnp.float32)             # (Ci,N,H,W)

    # ---- conv1 + BN1 + ReLU (bf16 intermediates: feed the bf16 im2col) -------
    y1, sc1, sh1 = _conv_layer_stats(x_c, params["w1"], params["b1"],
                                     params["g1"], params["beta1"], jnp.bfloat16)
    tile_r = _rowpass_tile_r(R, Co, 2, 2)
    h1 = _bn_relu_call(y1, sc1.reshape(Co, 1), sh1.reshape(Co, 1),
                       tile_r, jnp.bfloat16)                                  # (Co, R) bf16

    # ---- conv2 + BN2 + ReLU + fused 2x2 max-pool (f32 final path) ------------
    y2, sc2, sh2 = _conv_layer_stats(h1.reshape(Co, N, H, W), params["w2"],
                                     params["b2"], params["g2"], params["beta2"],
                                     jnp.float32)
    Rv, Cv = Co * N * H2, 2 * W
    y2_rows = y2.reshape(Rv, Cv)                 # rows = (c, n, h2); lanes = [2*h2 | 2*h2+1]
    sc2_rows = jnp.repeat(sc2, N * H2).reshape(Rv, 1)
    sh2_rows = jnp.repeat(sh2, N * H2).reshape(Rv, 1)
    sel = _pool_selectors(W)
    tile_rows = _pick_tile(Rv, max(8, POOL_TILE_BYTES // (Cv * 4)), 8)
    x2_rows, p_rows = _bn_relu_pool_call(y2_rows, sc2_rows, sh2_rows, sel, tile_rows)

    x_out = jnp.transpose(x2_rows.reshape(Co, N, H, W), (1, 0, 2, 3))
    p_out = jnp.transpose(p_rows.reshape(Co, N, H2, W2), (1, 0, 2, 3))
    return x_out, p_out


# --------------------------------------------------------------------------
# Pure-JAX f32 reference (PyTorch semantics) for the correctness check
# --------------------------------------------------------------------------
def _ref_conv_bn_relu(x_nhwc, w_oihw, cb, g, b):
    w_hwio = jnp.transpose(w_oihw, (2, 3, 1, 0))
    y = lax.conv_general_dilated(
        x_nhwc, w_hwio, (1, 1), "SAME",
        dimension_numbers=("NHWC", "HWIO", "NHWC"),
        precision=lax.Precision.HIGHEST,
    ) + cb
    mu = jnp.mean(y, axis=(0, 1, 2), keepdims=True)
    var = jnp.mean(jnp.square(y - mu), axis=(0, 1, 2), keepdims=True)
    y = (y - mu) * lax.rsqrt(var + BN_EPS) * g + b
    return jnp.maximum(y, 0.0)


def encoder_block_reference(x_nchw, params):
    x = jnp.transpose(x_nchw, (0, 2, 3, 1))
    h = _ref_conv_bn_relu(x, params["w1"], params["b1"], params["g1"], params["beta1"])
    h = _ref_conv_bn_relu(h, params["w2"], params["b2"], params["g2"], params["beta2"])
    N, H, W, C = h.shape
    p = h.reshape(N, H // 2, 2, W // 2, 2, C).max(axis=(2, 4))
    return jnp.transpose(h, (0, 3, 1, 2)), jnp.transpose(p, (0, 3, 1, 2))


# --------------------------------------------------------------------------
if __name__ == "__main__":
    key = jax.random.PRNGKey(0)
    N, in_c, out_c, H, W = 2, 4, 8, 16, 16
    ks = jax.random.split(key, 9)

    x = jax.random.normal(ks[0], (N, in_c, H, W), jnp.float32)
    params = {
        # nn.Conv2d weight/bias: (out_c, in_c, 3, 3) / (out_c,)
        "w1": 0.3 * jax.random.normal(ks[1], (out_c, in_c, 3, 3), jnp.float32),
        "b1": 0.3 * jax.random.normal(ks[2], (out_c,), jnp.float32),
        "w2": 0.3 * jax.random.normal(ks[3], (out_c, out_c, 3, 3), jnp.float32),
        "b2": 0.3 * jax.random.normal(ks[4], (out_c,), jnp.float32),
        # nn.BatchNorm2d affine params (out_c,)
        "g1": 1.0 + 0.1 * jax.random.normal(ks[5], (out_c,), jnp.float32),
        "beta1": 0.1 * jax.random.normal(ks[6], (out_c,), jnp.float32),
        "g2": 1.0 + 0.1 * jax.random.normal(ks[7], (out_c,), jnp.float32),
        "beta2": 0.1 * jax.random.normal(ks[8], (out_c,), jnp.float32),
    }

    x_out, p_out = encoder_block_forward(x, params)
    jax.block_until_ready((x_out, p_out))

    x_ref, p_ref = encoder_block_reference(x, params)
    assert x_out.shape == (N, out_c, H, W)
    assert p_out.shape == (N, out_c, H // 2, W // 2)
    # Kernel uses native bf16 MXU multiplies (f32 accumulation) and stores the
    # layer-1 intermediates in bf16; tolerance accounts for bf16 rounding across
    # the two conv+BN layers compared against the full-f32 reference.
    assert bool(jnp.allclose(x_out, x_ref, atol=4e-2, rtol=4e-2)), "conv output mismatch"
    assert bool(jnp.allclose(p_out, p_ref, atol=4e-2, rtol=4e-2)), "pooled output mismatch"
    print("KERNEL_OK")
</pallas_src>

<mosaic_0001>
module attributes {stable_mosaic.version = 11 : i64} {
  func.func @_conv_stats_kernel(%arg0: i32, %arg1: memref<8x36xbf16, #tpu.memory_space<vmem>>, %arg2: memref<36x512xbf16, #tpu.memory_space<vmem>>, %arg3: memref<8x1xf32, #tpu.memory_space<vmem>>, %arg4: memref<8x512xbf16, #tpu.memory_space<vmem>>, %arg5: memref<1x8x1xf32, #tpu.memory_space<vmem>>, %arg6: memref<1x8x1xf32, #tpu.memory_space<vmem>>) attributes {dimension_semantics = [#tpu.dimension_semantics<parallel>], iteration_bounds = array<i64: 1>, scalar_prefetch = 0 : i64, scratch_operands = 0 : i64, tpu.core_type = #tpu.core_type<tc>, window_params = [{pipeline_mode = #tpu.pipeline_mode<synchronous>, transform_indices = @transform_0, window_bounds = array<i64: 8, 36>}, {transform_indices = @transform_1, window_bounds = array<i64: 36, 512>}, {pipeline_mode = #tpu.pipeline_mode<synchronous>, transform_indices = @transform_2, window_bounds = array<i64: 8, 1>}, {transform_indices = @transform_3, window_bounds = array<i64: 8, 512>}, {transform_indices = @transform_4, window_bounds = array<i64: 1, 8, 1>}, {transform_indices = @transform_5, window_bounds = array<i64: 1, 8, 1>}]} {
    %c0 = arith.constant 0 : index
    %c0_0 = arith.constant 0 : index
    %0 = vector.load %arg1[%c0, %c0_0] : memref<8x36xbf16, #tpu.memory_space<vmem>>, vector<8x36xbf16>
    %c0_1 = arith.constant 0 : index
    %c0_2 = arith.constant 0 : index
    %1 = vector.load %arg2[%c0_1, %c0_2] : memref<36x512xbf16, #tpu.memory_space<vmem>>, vector<36x512xbf16>
    %cst = arith.constant dense<0.000000e+00> : vector<8x512xf32>
    %2 = tpu.matmul %0, %1, %cst {dimension_numbers = #tpu.dot_dimension_numbers<[1], [0], [0], [1], [0, 0, 1, 1], [], []>} : vector<8x36xbf16>, vector<36x512xbf16>, vector<8x512xf32> -> vector<8x512xf32>
    %c0_3 = arith.constant 0 : index
    %c0_4 = arith.constant 0 : index
    %3 = vector.load %arg3[%c0_3, %c0_4] : memref<8x1xf32, #tpu.memory_space<vmem>>, vector<8x1xf32>
    %4 = vector.broadcast %3 : vector<8x1xf32> to vector<8x512xf32>
    %5 = arith.addf %2, %4 : vector<8x512xf32>
    %6 = arith.truncf %5 : vector<8x512xf32> to vector<8x512xbf16>
    %c0_5 = arith.constant 0 : index
    %c0_6 = arith.constant 0 : index
    %7 = vector.load %arg4[%c0_5, %c0_6] : memref<8x512xbf16, #tpu.memory_space<vmem>>, vector<8x512xbf16>
    tpu.vector_store %arg4[%c0_5, %c0_6], %6 {strides = array<i32>} : memref<8x512xbf16, #tpu.memory_space<vmem>>, vector<8x512xbf16>,
    %cst_7 = arith.constant dense<0.000000e+00> : vector<8xf32>
    %8 = vector.multi_reduction <add>, %5, %cst_7 [1] : vector<8x512xf32> to vector<8xf32>
    %9 = vector.shape_cast %8 : vector<8xf32> to vector<8x1xf32>
    %c0_8 = arith.constant 0 : index
    %c0_9 = arith.constant 0 : index
    %c0_10 = arith.constant 0 : index
    %10 = vector.load %arg5[%c0_8, %c0_9, %c0_10] : memref<1x8x1xf32, #tpu.memory_space<vmem>>, vector<1x8x1xf32>
    %11 = vector.shape_cast %10 : vector<1x8x1xf32> to vector<8x1xf32>
    %12 = vector.shape_cast %9 : vector<8x1xf32> to vector<1x8x1xf32>
    tpu.vector_store %arg5[%c0_8, %c0_9, %c0_10], %12 {strides = array<i32>} : memref<1x8x1xf32, #tpu.memory_space<vmem>>, vector<1x8x1xf32>,
    %13 = arith.mulf %5, %5 : vector<8x512xf32>
    %cst_11 = arith.constant dense<0.000000e+00> : vector<8xf32>
    %14 = vector.multi_reduction <add>, %13, %cst_11 [1] : vector<8x512xf32> to vector<8xf32>
    %15 = vector.shape_cast %14 : vector<8xf32> to vector<8x1xf32>
    %c0_12 = arith.constant 0 : index
    %c0_13 = arith.constant 0 : index
    %c0_14 = arith.constant 0 : index
    %16 = vector.load %arg6[%c0_12, %c0_13, %c0_14] : memref<1x8x1xf32, #tpu.memory_space<vmem>>, vector<1x8x1xf32>
    %17 = vector.shape_cast %16 : vector<1x8x1xf32> to vector<8x1xf32>
    %18 = vector.shape_cast %15 : vector<8x1xf32> to vector<1x8x1xf32>
    tpu.vector_store %arg6[%c0_12, %c0_13, %c0_14], %18 {strides = array<i32>} : memref<1x8x1xf32, #tpu.memory_space<vmem>>, vector<1x8x1xf32>,
    return
  }
  func.func @transform_0(%arg0: i32) -> (i32, i32) {
    %c0_i32 = arith.constant 0 : i32
    %c0_i32_0 = arith.constant 0 : i32
    %c0_i32_1 = arith.constant 0 : i32
    return %c0_i32, %c0_i32_0 : i32, i32
  }
  func.func @transform_1(%arg0: i32) -> (i32, i32) {
    %c0_i32 = arith.constant 0 : i32
    %c0_i32_0 = arith.constant 0 : i32
    return %c0_i32, %arg0 : i32, i32
  }
  func.func @transform_2(%arg0: i32) -> (i32, i32) {
    %c0_i32 = arith.constant 0 : i32
    %c0_i32_0 = arith.constant 0 : i32
    %c0_i32_1 = arith.constant 0 : i32
    return %c0_i32, %c0_i32_0 : i32, i32
  }
  func.func @transform_3(%arg0: i32) -> (i32, i32) {
    %c0_i32 = arith.constant 0 : i32
    %c0_i32_0 = arith.constant 0 : i32
    return %c0_i32, %arg0 : i32, i32
  }
  func.func @transform_4(%arg0: i32) -> (i32, i32, i32) {
    %c0_i32 = arith.constant 0 : i32
    %c0_i32_0 = arith.constant 0 : i32
    %c0_i32_1 = arith.constant 0 : i32
    return %arg0, %c0_i32, %c0_i32_0 : i32, i32, i32
  }
  func.func @transform_5(%arg0: i32) -> (i32, i32, i32) {
    %c0_i32 = arith.constant 0 : i32
    %c0_i32_0 = arith.constant 0 : i32
    %c0_i32_1 = arith.constant 0 : i32
    return %arg0, %c0_i32, %c0_i32_0 : i32, i32, i32
  }
}

module attributes {stable_mosaic.version = 11 : i64} {
  func.func @_bn_relu_kernel(%arg0: i32, %arg1: memref<8x512xbf16, #tpu.memory_space<vmem>>, %arg2: memref<8x1xf32, #tpu.memory_space<vmem>>, %arg3: memref<8x1xf32, #tpu.memory_space<vmem>>, %arg4: memref<8x512xbf16, #tpu.memory_space<vmem>>) attributes {dimension_semantics = [#tpu.dimension_semantics<parallel>], iteration_bounds = array<i64: 1>, scalar_prefetch = 0 : i64, scratch_operands = 0 : i64, tpu.core_type = #tpu.core_type<tc>, window_params = [{transform_indices = @transform_0, window_bounds = array<i64: 8, 512>}, {pipeline_mode = #tpu.pipeline_mode<synchronous>, transform_indices = @transform_1, window_bounds = array<i64: 8, 1>}, {pipeline_mode = #tpu.pipeline_mode<synchronous>, transform_indices = @transform_2, window_bounds = array<i64: 8, 1>}, {transform_indices = @transform_3, window_bounds = array<i64: 8, 512>}]} {
    %c0 = arith.constant 0 : index
    %c0_0 = arith.constant 0 : index
    %0 = vector.load %arg1[%c0, %c0_0] : memref<8x512xbf16, #tpu.memory_space<vmem>>, vector<8x512xbf16>
    %1 = arith.extf %0 : vector<8x512xbf16> to vector<8x512xf32>
    %c0_1 = arith.constant 0 : index
    %c0_2 = arith.constant 0 : index
    %2 = vector.load %arg2[%c0_1, %c0_2] : memref<8x1xf32, #tpu.memory_space<vmem>>, vector<8x1xf32>
    %3 = vector.broadcast %2 : vector<8x1xf32> to vector<8x512xf32>
    %4 = arith.mulf %1, %3 : vector<8x512xf32>
    %c0_3 = arith.constant 0 : index
    %c0_4 = arith.constant 0 : index
    %5 = vector.load %arg3[%c0_3, %c0_4] : memref<8x1xf32, #tpu.memory_space<vmem>>, vector<8x1xf32>
    %6 = vector.broadcast %5 : vector<8x1xf32> to vector<8x512xf32>
    %7 = arith.addf %4, %6 : vector<8x512xf32>
    %cst = arith.constant 0.000000e+00 : f32
    %8 = vector.broadcast %cst : f32 to vector<8x512xf32>
    %9 = arith.maximumf %7, %8 : vector<8x512xf32>
    %10 = arith.truncf %9 : vector<8x512xf32> to vector<8x512xbf16>
    %c0_5 = arith.constant 0 : index
    %c0_6 = arith.constant 0 : index
    %11 = vector.load %arg4[%c0_5, %c0_6] : memref<8x512xbf16, #tpu.memory_space<vmem>>, vector<8x512xbf16>
    tpu.vector_store %arg4[%c0_5, %c0_6], %10 {strides = array<i32>} : memref<8x512xbf16, #tpu.memory_space<vmem>>, vector<8x512xbf16>,
    return
  }
  func.func @transform_0(%arg0: i32) -> (i32, i32) {
    %c0_i32 = arith.constant 0 : i32
    %c0_i32_0 = arith.constant 0 : i32
    return %c0_i32, %arg0 : i32, i32
  }
  func.func @transform_1(%arg0: i32) -> (i32, i32) {
    %c0_i32 = arith.constant 0 : i32
    %c0_i32_0 = arith.constant 0 : i32
    %c0_i32_1 = arith.constant 0 : i32
    return %c0_i32, %c0_i32_0 : i32, i32
  }
  func.func @transform_2(%arg0: i32) -> (i32, i32) {
    %c0_i32 = arith.constant 0 : i32
    %c0_i32_0 = arith.constant 0 : i32
    %c0_i32_1 = arith.constant 0 : i32
    return %c0_i32, %c0_i32_0 : i32, i32
  }
  func.func @transform_3(%arg0: i32) -> (i32, i32) {
    %c0_i32 = arith.constant 0 : i32
    %c0_i32_0 = arith.constant 0 : i32
    return %c0_i32, %arg0 : i32, i32
  }
}

module attributes {stable_mosaic.version = 11 : i64} {
  func.func @_conv_stats_kernel(%arg0: i32, %arg1: memref<8x72xbf16, #tpu.memory_space<vmem>>, %arg2: memref<72x512xbf16, #tpu.memory_space<vmem>>, %arg3: memref<8x1xf32, #tpu.memory_space<vmem>>, %arg4: memref<8x512xf32, #tpu.memory_space<vmem>>, %arg5: memref<1x8x1xf32, #tpu.memory_space<vmem>>, %arg6: memref<1x8x1xf32, #tpu.memory_space<vmem>>) attributes {dimension_semantics = [#tpu.dimension_semantics<parallel>], iteration_bounds = array<i64: 1>, scalar_prefetch = 0 : i64, scratch_operands = 0 : i64, tpu.core_type = #tpu.core_type<tc>, window_params = [{pipeline_mode = #tpu.pipeline_mode<synchronous>, transform_indices = @transform_0, window_bounds = array<i64: 8, 72>}, {transform_indices = @transform_1, window_bounds = array<i64: 72, 512>}, {pipeline_mode = #tpu.pipeline_mode<synchronous>, transform_indices = @transform_2, window_bounds = array<i64: 8, 1>}, {transform_indices = @transform_3, window_bounds = array<i64: 8, 512>}, {transform_indices = @transform_4, window_bounds = array<i64: 1, 8, 1>}, {transform_indices = @transform_5, window_bounds = array<i64: 1, 8, 1>}]} {
    %c0 = arith.constant 0 : index
    %c0_0 = arith.constant 0 : index
    %0 = vector.load %arg1[%c0, %c0_0] : memref<8x72xbf16, #tpu.memory_space<vmem>>, vector<8x72xbf16>
    %c0_1 = arith.constant 0 : index
    %c0_2 = arith.constant 0 : index
    %1 = vector.load %arg2[%c0_1, %c0_2] : memref<72x512xbf16, #tpu.memory_space<vmem>>, vector<72x512xbf16>
    %cst = arith.constant dense<0.000000e+00> : vector<8x512xf32>
    %2 = tpu.matmul %0, %1, %cst {dimension_numbers = #tpu.dot_dimension_numbers<[1], [0], [0], [1], [0, 0, 1, 1], [], []>} : vector<8x72xbf16>, vector<72x512xbf16>, vector<8x512xf32> -> vector<8x512xf32>
    %c0_3 = arith.constant 0 : index
    %c0_4 = arith.constant 0 : index
    %3 = vector.load %arg3[%c0_3, %c0_4] : memref<8x1xf32, #tpu.memory_space<vmem>>, vector<8x1xf32>
    %4 = vector.broadcast %3 : vector<8x1xf32> to vector<8x512xf32>
    %5 = arith.addf %2, %4 : vector<8x512xf32>
    %c0_5 = arith.constant 0 : index
    %c0_6 = arith.constant 0 : index
    %6 = vector.load %arg4[%c0_5, %c0_6] : memref<8x512xf32, #tpu.memory_space<vmem>>, vector<8x512xf32>
    tpu.vector_store %arg4[%c0_5, %c0_6], %5 {strides = array<i32>} : memref<8x512xf32, #tpu.memory_space<vmem>>, vector<8x512xf32>,
    %cst_7 = arith.constant dense<0.000000e+00> : vector<8xf32>
    %7 = vector.multi_reduction <add>, %5, %cst_7 [1] : vector<8x512xf32> to vector<8xf32>
    %8 = vector.shape_cast %7 : vector<8xf32> to vector<8x1xf32>
    %c0_8 = arith.constant 0 : index
    %c0_9 = arith.constant 0 : index
    %c0_10 = arith.constant 0 : index
    %9 = vector.load %arg5[%c0_8, %c0_9, %c0_10] : memref<1x8x1xf32, #tpu.memory_space<vmem>>, vector<1x8x1xf32>
    %10 = vector.shape_cast %9 : vector<1x8x1xf32> to vector<8x1xf32>
    %11 = vector.shape_cast %8 : vector<8x1xf32> to vector<1x8x1xf32>
    tpu.vector_store %arg5[%c0_8, %c0_9, %c0_10], %11 {strides = array<i32>} : memref<1x8x1xf32, #tpu.memory_space<vmem>>, vector<1x8x1xf32>,
    %12 = arith.mulf %5, %5 : vector<8x512xf32>
    %cst_11 = arith.constant dense<0.000000e+00> : vector<8xf32>
    %13 = vector.multi_reduction <add>, %12, %cst_11 [1] : vector<8x512xf32> to vector<8xf32>
    %14 = vector.shape_cast %13 : vector<8xf32> to vector<8x1xf32>
    %c0_12 = arith.constant 0 : index
    %c0_13 = arith.constant 0 : index
    %c0_14 = arith.constant 0 : index
    %15 = vector.load %arg6[%c0_12, %c0_13, %c0_14] : memref<1x8x1xf32, #tpu.memory_space<vmem>>, vector<1x8x1xf32>
    %16 = vector.shape_cast %15 : vector<1x8x1xf32> to vector<8x1xf32>
    %17 = vector.shape_cast %14 : vector<8x1xf32> to vector<1x8x1xf32>
    tpu.vector_store %arg6[%c0_12, %c0_13, %c0_14], %17 {strides = array<i32>} : memref<1x8x1xf32, #tpu.memory_space<vmem>>, vector<1x8x1xf32>,
    return
  }
  func.func @transform_0(%arg0: i32) -> (i32, i32) {
    %c0_i32 = arith.constant 0 : i32
    %c0_i32_0 = arith.constant 0 : i32
    %c0_i32_1 = arith.constant 0 : i32
    return %c0_i32, %c0_i32_0 : i32, i32
  }
  func.func @transform_1(%arg0: i32) -> (i32, i32) {
    %c0_i32 = arith.constant 0 : i32
    %c0_i32_0 = arith.constant 0 : i32
    return %c0_i32, %arg0 : i32, i32
  }
  func.func @transform_2(%arg0: i32) -> (i32, i32) {
    %c0_i32 = arith.constant 0 : i32
    %c0_i32_0 = arith.constant 0 : i32
    %c0_i32_1 = arith.constant 0 : i32
    return %c0_i32, %c0_i32_0 : i32, i32
  }
  func.func @transform_3(%arg0: i32) -> (i32, i32) {
    %c0_i32 = arith.constant 0 : i32
    %c0_i32_0 = arith.constant 0 : i32
    return %c0_i32, %arg0 : i32, i32
  }
  func.func @transform_4(%arg0: i32) -> (i32, i32, i32) {
    %c0_i32 = arith.constant 0 : i32
    %c0_i32_0 = arith.constant 0 : i32
    %c0_i32_1 = arith.constant 0 : i32
    return %arg0, %c0_i32, %c0_i32_0 : i32, i32, i32
  }
  func.func @transform_5(%arg0: i32) -> (i32, i32, i32) {
    %c0_i32 = arith.constant 0 : i32
    %c0_i32_0 = arith.constant 0 : i32
    %c0_i32_1 = arith.constant 0 : i32
    return %arg0, %c0_i32, %c0_i32_0 : i32, i32, i32
  }
}

module attributes {stable_mosaic.version = 11 : i64} {
  func.func @_bn_relu_pool_kernel(%arg0: i32, %arg1: memref<128x32xf32, #tpu.memory_space<vmem>>, %arg2: memref<128x1xf32, #tpu.memory_space<vmem>>, %arg3: memref<128x1xf32, #tpu.memory_space<vmem>>, %arg4: memref<4x32x8xf32, #tpu.memory_space<vmem>>, %arg5: memref<128x32xf32, #tpu.memory_space<vmem>>, %arg6: memref<128x8xf32, #tpu.memory_space<vmem>>) attributes {dimension_semantics = [#tpu.dimension_semantics<parallel>], iteration_bounds = array<i64: 1>, scalar_prefetch = 0 : i64, scratch_operands = 0 : i64, tpu.core_type = #tpu.core_type<tc>, window_params = [{transform_indices = @transform_0, window_bounds = array<i64: 128, 32>}, {transform_indices = @transform_1, window_bounds = array<i64: 128, 1>}, {transform_indices = @transform_2, window_bounds = array<i64: 128, 1>}, {pipeline_mode = #tpu.pipeline_mode<synchronous>, transform_indices = @transform_3, window_bounds = array<i64: 4, 32, 8>}, {transform_indices = @transform_4, window_bounds = array<i64: 128, 32>}, {transform_indices = @transform_5, window_bounds = array<i64: 128, 8>}]} {
    %c0 = arith.constant 0 : index
    %c0_0 = arith.constant 0 : index
    %0 = vector.load %arg1[%c0, %c0_0] : memref<128x32xf32, #tpu.memory_space<vmem>>, vector<128x32xf32>
    %c0_1 = arith.constant 0 : index
    %c0_2 = arith.constant 0 : index
    %1 = vector.load %arg2[%c0_1, %c0_2] : memref<128x1xf32, #tpu.memory_space<vmem>>, vector<128x1xf32>
    %2 = vector.broadcast %1 : vector<128x1xf32> to vector<128x32xf32>
    %3 = arith.mulf %0, %2 : vector<128x32xf32>
    %c0_3 = arith.constant 0 : index
    %c0_4 = arith.constant 0 : index
    %4 = vector.load %arg3[%c0_3, %c0_4] : memref<128x1xf32, #tpu.memory_space<vmem>>, vector<128x1xf32>
    %5 = vector.broadcast %4 : vector<128x1xf32> to vector<128x32xf32>
    %6 = arith.addf %3, %5 : vector<128x32xf32>
    %cst = arith.constant 0.000000e+00 : f32
    %7 = vector.broadcast %cst : f32 to vector<128x32xf32>
    %8 = arith.maximumf %6, %7 : vector<128x32xf32>
    %c0_5 = arith.constant 0 : index
    %c0_6 = arith.constant 0 : index
    %9 = vector.load %arg5[%c0_5, %c0_6] : memref<128x32xf32, #tpu.memory_space<vmem>>, vector<128x32xf32>
    tpu.vector_store %arg5[%c0_5, %c0_6], %8 {strides = array<i32>} : memref<128x32xf32, #tpu.memory_space<vmem>>, vector<128x32xf32>,
    %c0_7 = arith.constant 0 : index
    %c0_8 = arith.constant 0 : index
    %c0_9 = arith.constant 0 : index
    %10 = vector.load %arg4[%c0_7, %c0_8, %c0_9] : memref<4x32x8xf32, #tpu.memory_space<vmem>>, vector<1x32x8xf32>
    %11 = vector.shape_cast %10 : vector<1x32x8xf32> to vector<32x8xf32>
    %cst_10 = arith.constant dense<0.000000e+00> : vector<128x8xf32>
    %12 = tpu.matmul %8, %11, %cst_10 {dimension_numbers = #tpu.dot_dimension_numbers<[1], [0], [0], [1], [0, 0, 1, 1], [], []>} : vector<128x32xf32>, vector<32x8xf32>, vector<128x8xf32> -> vector<128x8xf32>
    %c1 = arith.constant 1 : index
    %c0_11 = arith.constant 0 : index
    %c0_12 = arith.constant 0 : index
    %13 = vector.load %arg4[%c1, %c0_11, %c0_12] : memref<4x32x8xf32, #tpu.memory_space<vmem>>, vector<1x32x8xf32>
    %14 = vector.shape_cast %13 : vector<1x32x8xf32> to vector<32x8xf32>
    %cst_13 = arith.constant dense<0.000000e+00> : vector<128x8xf32>
    %15 = tpu.matmul %8, %14, %cst_13 {dimension_numbers = #tpu.dot_dimension_numbers<[1], [0], [0], [1], [0, 0, 1, 1], [], []>} : vector<128x32xf32>, vector<32x8xf32>, vector<128x8xf32> -> vector<128x8xf32>
    %16 = arith.maximumf %12, %15 : vector<128x8xf32>
    %c2 = arith.constant 2 : index
    %c0_14 = arith.constant 0 : index
    %c0_15 = arith.constant 0 : index
    %17 = vector.load %arg4[%c2, %c0_14, %c0_15] : memref<4x32x8xf32, #tpu.memory_space<vmem>>, vector<1x32x8xf32>
    %18 = vector.shape_cast %17 : vector<1x32x8xf32> to vector<32x8xf32>
    %cst_16 = arith.constant dense<0.000000e+00> : vector<128x8xf32>
    %19 = tpu.matmul %8, %18, %cst_16 {dimension_numbers = #tpu.dot_dimension_numbers<[1], [0], [0], [1], [0, 0, 1, 1], [], []>} : vector<128x32xf32>, vector<32x8xf32>, vector<128x8xf32> -> vector<128x8xf32>
    %20 = arith.maximumf %16, %19 : vector<128x8xf32>
    %c3 = arith.constant 3 : index
    %c0_17 = arith.constant 0 : index
    %c0_18 = arith.constant 0 : index
    %21 = vector.load %arg4[%c3, %c0_17, %c0_18] : memref<4x32x8xf32, #tpu.memory_space<vmem>>, vector<1x32x8xf32>
    %22 = vector.shape_cast %21 : vector<1x32x8xf32> to vector<32x8xf32>
    %cst_19 = arith.constant dense<0.000000e+00> : vector<128x8xf32>
    %23 = tpu.matmul %8, %22, %cst_19 {dimension_numbers = #tpu.dot_dimension_numbers<[1], [0], [0], [1], [0, 0, 1, 1], [], []>} : vector<128x32xf32>, vector<32x8xf32>, vector<128x8xf32> -> vector<128x8xf32>
    %24 = arith.maximumf %20, %23 : vector<128x8xf32>
    %c0_20 = arith.constant 0 : index
    %c0_21 = arith.constant 0 : index
    %25 = vector.load %arg6[%c0_20, %c0_21] : memref<128x8xf32, #tpu.memory_space<vmem>>, vector<128x8xf32>
    tpu.vector_store %arg6[%c0_20, %c0_21], %24 {strides = array<i32>} : memref<128x8xf32, #tpu.memory_space<vmem>>, vector<128x8xf32>,
    return
  }
  func.func @transform_0(%arg0: i32) -> (i32, i32) {
    %c0_i32 = arith.constant 0 : i32
    %c0_i32_0 = arith.constant 0 : i32
    return %arg0, %c0_i32 : i32, i32
  }
  func.func @transform_1(%arg0: i32) -> (i32, i32) {
    %c0_i32 = arith.constant 0 : i32
    %c0_i32_0 = arith.constant 0 : i32
    return %arg0, %c0_i32 : i32, i32
  }
  func.func @transform_2(%arg0: i32) -> (i32, i32) {
    %c0_i32 = arith.constant 0 : i32
    %c0_i32_0 = arith.constant 0 : i32
    return %arg0, %c0_i32 : i32, i32
  }
  func.func @transform_3(%arg0: i32) -> (i32, i32, i32) {
    %c0_i32 = arith.constant 0 : i32
    %c0_i32_0 = arith.constant 0 : i32
    %c0_i32_1 = arith.constant 0 : i32
    %c0_i32_2 = arith.constant 0 : i32
    return %c0_i32, %c0_i32_0, %c0_i32_1 : i32, i32, i32
  }
  func.func @transform_4(%arg0: i32) -> (i32, i32) {
    %c0_i32 = arith.constant 0 : i32
    %c0_i32_0 = arith.constant 0 : i32
    return %arg0, %c0_i32 : i32, i32
  }
  func.func @transform_5(%arg0: i32) -> (i32, i32) {
    %c0_i32 = arith.constant 0 : i32
    %c0_i32_0 = arith.constant 0 : i32
    return %arg0, %c0_i32 : i32, i32
  }
}

</mosaic_0001>

<bundles_post_ra>
// kernel: encoder_block_forward.5
= control target key start
LH: loop header
LB: loop body
LE: loop exit
PB: predicated region body
PF: predicated region fallthrough
CT: control target
= control target key end

     0   :  { %v72_v0 = vmov 0   ;;  %s111_s1 = inlined_call_operand.vmem [shape: f32[8,1], index: 1, kind: input, shape index: {}]   ;;  %s112_s2 = inlined_call_operand.vmem [shape: f32[8,1], index: 2, kind: input, shape index: {}]   ;;  %s113_s0 = inlined_call_operand.vmem [shape: bf16[8,512], index: 0, kind: input, shape index: {}]   ;;  %s114_s3 = inlined_call_operand.vmem [shape: bf16[8,512], index: 3, kind: output, shape index: {}]  }
   0x1   :  { %71 = vset.pattern.permute.xlu0 %v72_v0  ;;  %v20_v1 = vld [vmem:[%s111_s1] sm:$0xff]  ;;  %v15_v4 = vld [vmem:[%s113_s0 + $0x8] sm:$0xff] }
   0x2   :  { %23 = vperm.xlu0 %71, %v20_v1   ;;  %v30_v2 = vld [vmem:[%s112_s2] sm:$0xff]  ;;  %v18_v7 = vunpack.c.l.bf16 %v15_v4  ;;  %v19_v8 = vunpack.c.h.bf16 %v15_v4 }
   0x3   :  { %v14_v3 = vld [vmem:[%s113_s0] sm:$0xff] }
   0x4   :  { %v16_v5 = vunpack.c.l.bf16 %v14_v3  ;;  %v17_v6 = vunpack.c.h.bf16 %v14_v3 }
   0x6   :  { %33 = vperm.xlu0 %71, %v30_v2  }
  0x81   :  { %v24_v9 = vpop.permute.xlu0 %23 }
  0x82   :  { %v26_v10 = vmul.f32 %v24_v9, %v16_v5  ;;  %v27_v11 = vmul.f32 %v24_v9, %v17_v6  ;;  %v28_v12 = vmul.f32 %v24_v9, %v18_v7  ;;  %v29_v13 = vmul.f32 %v24_v9, %v19_v8 }
  0x85   :  { %v34_v14 = vpop.permute.xlu0 %33 }
  0x86   :  { %v36_v15 = vadd.f32 %v34_v14, %v26_v10  ;;  %v37_v16 = vadd.f32 %v34_v14, %v27_v11  ;;  %v38_v17 = vadd.f32 %v34_v14, %v28_v12  ;;  %v39_v18 = vadd.f32 %v34_v14, %v29_v13 }
  0x88   :  { %v40_v19 = vmax.f32 %v36_v15, 0.0  ;;  %v41_v20 = vmax.f32 %v37_v16, 0.0  ;;  %v42_v21 = vmax.f32 %v38_v17, 0.0  ;;  %v43_v22 = vmax.f32 %v39_v18, 0.0 }
  0x8a   :  { %v68_v23 = vpack.c.bf16 %v41_v20, %v40_v19  ;;  %v69_v24 = vpack.c.bf16 %v43_v22, %v42_v21 }
  0x8c   :  { %60 = vst [vmem:[%s114_s3] sm:$0xff] %v68_v23  ;;  %61 = vst [vmem:[%s114_s3 + $0x8] sm:$0xff] %v69_v24 }

// kernel: encoder_block_forward.4
= control target key start
LH: loop header
LB: loop body
LE: loop exit
PB: predicated region body
PF: predicated region fallthrough
CT: control target
= control target key end

     0   :  { %v269_v1 = vmov 0   ;;  %vm89_vm0 = vcmask 1041408   ;;  %vm85_vm1 = vcmask 293888   ;;  %vm207_vm2 = vcmask 7168   ;;  %s352_s1 = inlined_call_operand.vmem [shape: bf16[36,512], index: 1, kind: input, shape index: {}]   ;;  %s353_s2 = inlined_call_operand.vmem [shape: f32[8,1], index: 2, kind: input, shape index: {}]   ;;  %s354_s0 = inlined_call_operand.vmem [shape: bf16[8,36], index: 0, kind: input, shape index: {}]   ;;  %s355_s3 = inlined_call_operand.vmem [shape: bf16[8,512], index: 3, kind: output, shape index: {0}]   ;;  %s356_s4 = inlined_call_operand.vmem [shape: f32[1,8,1], index: 4, kind: output, shape index: {1}]   ;;  %s357_s5 = inlined_call_operand.vmem [shape: f32[1,8,1], index: 5, kind: output, shape index: {2}]  }
   0x1   :  { %v253_v0 = vld [vmem:[%s352_s1 + $0x4] ss:$16 sps:$4 sm:$0xff]   ;;  %134 = vmatprep.mubr.bf16.mxu0 %v269_v1  ;;  %175 = vmatprep.mubr.bf16.mxu1 %v269_v1  ;;  %v255_v2 = vld [vmem:[%s352_s1 + $0xc] ss:$16 sps:$4 sm:$0xff]   ;;  %v257_v3 = vld [vmem:[%s352_s1] ss:$16 sps:$4 sm:$0xff]  }
   0x2   :  { %252 = vset.pattern.permute.xlu0 %v269_v1  ;;  %102 = vmatprep.subr.bf16.mxu0 %v253_v0  ;;  %v258_v4 = vld [vmem:[%s352_s1 + $0x8] ss:$16 sps:$4 sm:$0xff]   ;;  %v259_v5 = vld [vmem:[%s352_s1 + $0x24] ss:$16 sps:$4 sm:$0xff]   ;;  %v261_v6 = vld [vmem:[%s352_s1 + $0x2c] ss:$16 sps:$4 sm:$0xff]  }
   0x3   :  { %143 = vmatprep.subr.bf16.mxu1 %v255_v2  ;;  %103 = vmatpush1.bf16.msra.mxu0 %v257_v3  ;;  %v263_v7 = vld [vmem:[%s352_s1 + $0x20] ss:$16 sps:$4 sm:$0xff]   ;;  %v264_v8 = vld [vmem:[%s352_s1 + $0x28] ss:$16 sps:$4 sm:$0xff]  }
   0x4   :  { %144 = vmatpush1.bf16.msra.mxu1 %v258_v4  ;;  %104 = vmatprep.subr.bf16.mxu0 %v259_v5  ;;  %v27_v9 = vld [vmem:[%s352_s1 + $0x40] sm:$0x33]  ;;  %v28_v10 = vld [vmem:[%s352_s1 + $0x48] sm:$0x33] }
   0x5   :  { %145 = vmatprep.subr.bf16.mxu1 %v261_v6  ;;  %v240_v11 = vcombine.high %v27_v9, %v27_v9  ;;  %v242_v12 = vcombine.high %v28_v10, %v28_v10  ;;  %v239_v13 = vcombine.low %v27_v9, %v27_v9  ;;  %v241_v14 = vcombine.low %v28_v10, %v28_v10  ;;  %v29_v15 = vld [vmem:[%s353_s2] sm:$0xff] }
   0x6   :  { %32 = vperm.xlu0 %252, %v29_v15   ;;  %v18_v18 = vld [vmem:[%s354_s0] sm:$0xf] }
   0x7   :  { %105 = vmatpush1.bf16.msra.mxu0 %v263_v7  ;;  %v91_v16 = vsel %vm89_vm0, %v239_v13, 0  ;;  %v97_v17 = vsel %vm89_vm0, %v241_v14, 0 }
   0x8   :  { %146 = vmatpush1.bf16.msra.mxu1 %v264_v8  ;;  %243 = vmatprep.subr.msk.bf16.mxu0 %vm89_vm0, %v240_v11 }
   0x9   :  { %245 = vmatprep.subr.msk.bf16.mxu1 %vm89_vm0, %v242_v12 }
   0xb   :  { %107 = vmatpush1.bf16.msra.mxu0 %v91_v16 }
   0xc   :  { %148 = vmatpush1.bf16.msra.mxu1 %v97_v17 }
   0xe   :  { %244 = vmatmul.mubr.msk.bf16.vlgmr.msra.gmra.mrb[0].mxu0 %vm85_vm1, %v18_v18 }
   0xf   :  { %246 = vmatmul.mubr.msk.bf16.vlgmr.msra.gmra.mrb[0].mxu1 %vm85_vm1, %v18_v18 }
  0x85   :  { %v33_v19 = vpop.permute.xlu0 %32 }
  0xe1   :  { %v136_v20 = vpop.f32.mrb[0].mxu0 }
  0xe2   :  { %v177_v21 = vpop.f32.mrb[0].mxu1  ;;  %v137_v22 = vadd.f32 %v136_v20, %v33_v19  ;;  %v138_v24 = vpop.f32.mrb[1].mxu0 }
  0xe3   :  { %v178_v23 = vadd.f32 %v177_v21, %v33_v19  ;;  %v179_v25 = vpop.f32.mrb[1].mxu1  ;;  %v139_v26 = vadd.f32 %v138_v24, %v33_v19  ;;  %v140_v28 = vpop.f32.mrb[2].mxu0 }
  0xe4   :  { %v180_v27 = vadd.f32 %v179_v25, %v33_v19  ;;  %v181_v29 = vpop.f32.mrb[2].mxu1  ;;  %v209_v30 = vmul.f32 %v137_v22, %v137_v22  ;;  %v141_v31 = vpop.f32.mrb[3].mxu0 }
  0xe5   :  { %v182_v32 = vpop.f32.mrb[3].mxu1  ;;  %v249_v33 = vpack.c.bf16 %v139_v26, %v137_v22  ;;  %v202_v34 = vadd.f32 %v139_v26, %v137_v22  ;;  %v210_v35 = vmul.f32 %v139_v26, %v139_v26  ;;  %v211_v38 = vmul.f32 %v178_v23, %v178_v23 }
  0xe6   :  { %v250_v36 = vpack.c.bf16 %v180_v27, %v178_v23  ;;  %v212_v41 = vmul.f32 %v180_v27, %v180_v27 }
  0xe7   :  { %200 = vst [vmem:[%s355_s3] sm:$0xff] %v249_v33  ;;  %v203_v37 = vadd.f32 %v202_v34, %v178_v23  ;;  %v213_v39 = vadd.f32 %v210_v35, %v209_v30 }
  0xe8   :  { %201 = vst [vmem:[%s355_s3 + $0x8] sm:$0xff] %v250_v36 }
  0xe9   :  { %v204_v40 = vadd.f32 %v203_v37, %v180_v27  ;;  %v214_v42 = vadd.f32 %v213_v39, %v211_v38 }
  0xeb   :  { %205 = vadd.xlane.f32.xlu0 %v204_v40  ;;  %v215_v43 = vadd.f32 %v214_v42, %v212_v41 }
  0xed   :  { %216 = vadd.xlane.f32.xlu1 %v215_v43 }
 0x178   :  { %v206_v44 = vpop.xlane.xlu0 %205 }
 0x179   :  { %208 = vst.msk [vmem:[%s356_s4] sm:$0xff] %vm207_vm2, %v206_v44 }
 0x17a   :  { %v217_v45 = vpop.xlane.xlu1 %216 }
 0x17b   :  { %218 = vst.msk [vmem:[%s357_s5] sm:$0xff] %vm207_vm2, %v217_v45 }

// kernel: encoder_block_forward.6
= control target key start
LH: loop header
LB: loop body
LE: loop exit
PB: predicated region body
PF: predicated region fallthrough
CT: control target
= control target key end

     0   :  { %v319_v1 = vmov 0   ;;  %vm137_vm0 = vcmask 1043456   ;;  %vm133_vm1 = vcmask 588800   ;;  %vm241_vm2 = vcmask 7168   ;;  %s428_s1 = inlined_call_operand.vmem [shape: bf16[72,512], index: 1, kind: input, shape index: {}]   ;;  %s429_s2 = inlined_call_operand.vmem [shape: f32[8,1], index: 2, kind: input, shape index: {}]   ;;  %s430_s0 = inlined_call_operand.vmem [shape: bf16[8,72], index: 0, kind: input, shape index: {}]   ;;  %s431_s3 = inlined_call_operand.vmem [shape: f32[8,512], index: 3, kind: output, shape index: {0}]   ;;  %s432_s4 = inlined_call_operand.vmem [shape: f32[1,8,1], index: 4, kind: output, shape index: {1}]   ;;  %s433_s5 = inlined_call_operand.vmem [shape: f32[1,8,1], index: 5, kind: output, shape index: {2}]  }
   0x1   :  { %v291_v0 = vld [vmem:[%s428_s1 + $0x4] ss:$16 sps:$4 sm:$0xff]   ;;  %182 = vmatprep.mubr.bf16.mxu0 %v319_v1  ;;  %223 = vmatprep.mubr.bf16.mxu1 %v319_v1  ;;  %v293_v2 = vld [vmem:[%s428_s1 + $0xc] ss:$16 sps:$4 sm:$0xff]   ;;  %v295_v3 = vld [vmem:[%s428_s1] ss:$16 sps:$4 sm:$0xff]  }
   0x2   :  { %290 = vset.pattern.permute.xlu0 %v319_v1  ;;  %150 = vmatprep.subr.bf16.mxu0 %v291_v0  ;;  %v296_v4 = vld [vmem:[%s428_s1 + $0x8] ss:$16 sps:$4 sm:$0xff]   ;;  %v297_v5 = vld [vmem:[%s428_s1 + $0x24] ss:$16 sps:$4 sm:$0xff]   ;;  %v299_v6 = vld [vmem:[%s428_s1 + $0x2c] ss:$16 sps:$4 sm:$0xff]  }
   0x3   :  { %191 = vmatprep.subr.bf16.mxu1 %v293_v2  ;;  %151 = vmatpush1.bf16.msra.mxu0 %v295_v3  ;;  %v301_v7 = vld [vmem:[%s428_s1 + $0x20] ss:$16 sps:$4 sm:$0xff]   ;;  %v302_v8 = vld [vmem:[%s428_s1 + $0x28] ss:$16 sps:$4 sm:$0xff]   ;;  %v303_v9 = vld [vmem:[%s428_s1 + $0x44] ss:$16 sps:$4 sm:$0xff]  }
   0x4   :  { %192 = vmatpush1.bf16.msra.mxu1 %v296_v4  ;;  %152 = vmatprep.subr.bf16.mxu0 %v297_v5  ;;  %v305_v10 = vld [vmem:[%s428_s1 + $0x4c] ss:$16 sps:$4 sm:$0xff]   ;;  %v307_v11 = vld [vmem:[%s428_s1 + $0x40] ss:$16 sps:$4 sm:$0xff]   ;;  %v308_v12 = vld [vmem:[%s428_s1 + $0x48] ss:$16 sps:$4 sm:$0xff]  }
   0x5   :  { %193 = vmatprep.subr.bf16.mxu1 %v299_v6  ;;  %v309_v13 = vld [vmem:[%s428_s1 + $0x64] ss:$16 sps:$4 sm:$0xff]   ;;  %v311_v14 = vld [vmem:[%s428_s1 + $0x6c] ss:$16 sps:$4 sm:$0xff]   ;;  %v313_v18 = vld [vmem:[%s428_s1 + $0x60] ss:$16 sps:$4 sm:$0xff]  }
   0x6   :  { %v35_v15 = vld [vmem:[%s428_s1 + $0x80] sm:$0xff]  ;;  %v36_v16 = vld [vmem:[%s428_s1 + $0x88] sm:$0xff] }
   0x7   :  { %153 = vmatpush1.bf16.msra.mxu0 %v301_v7  ;;  %v37_v17 = vld [vmem:[%s429_s2] sm:$0xff]  ;;  %v314_v19 = vld [vmem:[%s428_s1 + $0x68] ss:$16 sps:$4 sm:$0xff]   ;;  %v282_v20 = vcombine.high %v35_v15, %v35_v15  ;;  %v284_v21 = vcombine.high %v36_v16, %v36_v16  ;;  %v281_v22 = vcombine.low %v35_v15, %v35_v15  ;;  %v283_v23 = vcombine.low %v36_v16, %v36_v16 }
   0x8   :  { %194 = vmatpush1.bf16.msra.mxu1 %v302_v8  ;;  %154 = vmatprep.subr.bf16.mxu0 %v303_v9  ;;  %v18_v26 = vld [vmem:[%s430_s0] sm:$0xf] }
   0x9   :  { %195 = vmatprep.subr.bf16.mxu1 %v305_v10  ;;  %40 = vperm.xlu0 %290, %v37_v17   ;;  %v139_v24 = vsel %vm137_vm0, %v281_v22, 0  ;;  %v145_v25 = vsel %vm137_vm0, %v283_v23, 0 }
   0xb   :  { %155 = vmatpush1.bf16.msra.mxu0 %v307_v11 }
   0xc   :  { %196 = vmatpush1.bf16.msra.mxu1 %v308_v12  ;;  %156 = vmatprep.subr.bf16.mxu0 %v309_v13 }
   0xd   :  { %197 = vmatprep.subr.bf16.mxu1 %v311_v14 }
   0xf   :  { %157 = vmatpush1.bf16.msra.mxu0 %v313_v18 }
  0x10   :  { %198 = vmatpush1.bf16.msra.mxu1 %v314_v19  ;;  %285 = vmatprep.subr.msk.bf16.mxu0 %vm137_vm0, %v282_v20 }
  0x11   :  { %287 = vmatprep.subr.msk.bf16.mxu1 %vm137_vm0, %v284_v21 }
  0x13   :  { %159 = vmatpush1.bf16.msra.mxu0 %v139_v24 }
  0x14   :  { %200 = vmatpush1.bf16.msra.mxu1 %v145_v25 }
  0x16   :  { %286 = vmatmul.mubr.msk.bf16.vlgmr.msra.gmra.mrb[0].mxu0 %vm133_vm1, %v18_v26 }
  0x17   :  { %288 = vmatmul.mubr.msk.bf16.vlgmr.msra.gmra.mrb[0].mxu1 %vm133_vm1, %v18_v26 }
  0x88   :  { %v41_v27 = vpop.permute.xlu0 %40 }
  0xe9   :  { %v184_v28 = vpop.f32.mrb[0].mxu0 }
  0xea   :  { %v225_v29 = vpop.f32.mrb[0].mxu1  ;;  %v185_v30 = vadd.f32 %v184_v28, %v41_v27  ;;  %v186_v32 = vpop.f32.mrb[1].mxu0 }
  0xeb   :  { %v226_v31 = vadd.f32 %v225_v29, %v41_v27  ;;  %v227_v33 = vpop.f32.mrb[1].mxu1  ;;  %v187_v34 = vadd.f32 %v186_v32, %v41_v27  ;;  %v188_v36 = vpop.f32.mrb[2].mxu0 }
  0xec   :  { %v228_v35 = vadd.f32 %v227_v33, %v41_v27  ;;  %v229_v37 = vpop.f32.mrb[2].mxu1  ;;  %232 = vst [vmem:[%s431_s3] sm:$0xff] %v185_v30  ;;  %v243_v38 = vmul.f32 %v185_v30, %v185_v30  ;;  %v189_v39 = vpop.f32.mrb[3].mxu0 }
  0xed   :  { %234 = vst [vmem:[%s431_s3 + $0x10] sm:$0xff] %v226_v31  ;;  %v230_v40 = vpop.f32.mrb[3].mxu1  ;;  %233 = vst [vmem:[%s431_s3 + $0x8] sm:$0xff] %v187_v34  ;;  %v236_v41 = vadd.f32 %v187_v34, %v185_v30  ;;  %v244_v42 = vmul.f32 %v187_v34, %v187_v34  ;;  %v245_v44 = vmul.f32 %v226_v31, %v226_v31 }
  0xee   :  { %235 = vst [vmem:[%s431_s3 + $0x18] sm:$0xff] %v228_v35  ;;  %v246_v47 = vmul.f32 %v228_v35, %v228_v35 }
  0xef   :  { %v237_v43 = vadd.f32 %v236_v41, %v226_v31  ;;  %v247_v45 = vadd.f32 %v244_v42, %v243_v38 }
  0xf1   :  { %v238_v46 = vadd.f32 %v237_v43, %v228_v35  ;;  %v248_v48 = vadd.f32 %v247_v45, %v245_v44 }
  0xf3   :  { %239 = vadd.xlane.f32.xlu0 %v238_v46  ;;  %v249_v49 = vadd.f32 %v248_v48, %v246_v47 }
  0xf5   :  { %250 = vadd.xlane.f32.xlu1 %v249_v49 }
 0x180   :  { %v240_v50 = vpop.xlane.xlu0 %239 }
 0x181   :  { %242 = vst.msk [vmem:[%s432_s4] sm:$0xff] %vm241_vm2, %v240_v50 }
 0x182   :  { %v251_v51 = vpop.xlane.xlu1 %250 }
 0x183   :  { %252 = vst.msk [vmem:[%s433_s5] sm:$0xff] %vm241_vm2, %v251_v51 }

// kernel: encoder_block_forward.7
= control target key start
LH: loop header
LB: loop body
LE: loop exit
PB: predicated region body
PF: predicated region fallthrough
CT: control target
= control target key end

     0   :  { %v1331_v0 = vmov 0   ;;  %vm275_vm0 = vcmask 261120   ;;  %vm987_vm1 = vcmask 64512   ;;  %s1914_s2 = inlined_call_operand.vmem [shape: f32[128,1], index: 2, kind: input, shape index: {}]   ;;  %s1915_s1 = inlined_call_operand.vmem [shape: f32[128,1], index: 1, kind: input, shape index: {}]   ;;  %s1916_s3 = inlined_call_operand.vmem [shape: f32[4,32,8], index: 3, kind: input, shape index: {}]   ;;  %s1917_s0 = inlined_call_operand.vmem [shape: f32[128,32], index: 0, kind: input, shape index: {}]   ;;  %s1918_s4 = inlined_call_operand.vmem [shape: f32[128,32], index: 4, kind: output, shape index: {0}]   ;;  %s1919_s5 = inlined_call_operand.vmem [shape: f32[128,8], index: 5, kind: output, shape index: {1}]  }
   0x1   :  { %1330 = vset.pattern.permute.xlu1 %v1331_v0  ;;  %1329 = vset.pattern.permute.xlu0 %v1331_v0  ;;  %v147_v1 = vld [vmem:[%s1914_s2] sm:$0xff]  ;;  %v148_v3 = vld [vmem:[%s1914_s2 + $0x8] sm:$0xff]  ;;  %v38_v5 = vld [vmem:[%s1915_s1 + $0x18] sm:$0xff] }
   0x2   :  { %v35_v2 = vld [vmem:[%s1915_s1] sm:$0xff]  ;;  %165 = vperm.xlu1 %1330, %v147_v1   ;;  %v36_v4 = vld [vmem:[%s1915_s1 + $0x8] sm:$0xff]  ;;  %v37_v6 = vld [vmem:[%s1915_s1 + $0x10] sm:$0xff] }
   0x3   :  { %53 = vperm.xlu0 %1329, %v35_v2   ;;  %v150_v7 = vld [vmem:[%s1914_s2 + $0x18] sm:$0xff]  ;;  %v149_v8 = vld [vmem:[%s1914_s2 + $0x10] sm:$0xff]  ;;  %v292_v9 = vld [vmem:[%s1916_s3] sm:$0xff] }
   0x4   :  { %v293_v10 = vld [vmem:[%s1916_s3 + $0x8] sm:$0xff]  ;;  %v1028_v11 = vld [vmem:[%s1916_s3 + $0x20] sm:$0xff]  ;;  %v294_v14 = vld [vmem:[%s1916_s3 + $0x10] sm:$0xff] }
   0x5   :  { %v1296_v12 = vpack.c.bf16 %v293_v10, %v292_v9  ;;  %v1029_v13 = vld [vmem:[%s1916_s3 + $0x28] sm:$0xff]  ;;  %v295_v16 = vld [vmem:[%s1916_s3 + $0x18] sm:$0xff]  ;;  %v1030_v17 = vld [vmem:[%s1916_s3 + $0x30] sm:$0xff] }
   0x6   :  { %170 = vperm.xlu1 %1330, %v148_v3   ;;  %v1304_v15 = vpack.c.bf16 %v1029_v13, %v1028_v11  ;;  %v1031_v18 = vld [vmem:[%s1916_s3 + $0x38] sm:$0xff]  ;;  %v40_v19 = vld [vmem:[%s1915_s1 + $0x28] sm:$0xff]  ;;  %v39_v20 = vld [vmem:[%s1915_s1 + $0x20] sm:$0xff]  ;;  %v1300_v21 = vpack.c.bf16 %v295_v16, %v294_v14 }
   0x7   :  { %58 = vperm.xlu0 %1329, %v36_v4   ;;  %1297 = vmatprep.subr.bf16.mxu0 %v1296_v12  ;;  %v1308_v22 = vpack.c.bf16 %v1031_v18, %v1030_v17  ;;  %v152_v23 = vld [vmem:[%s1914_s2 + $0x28] sm:$0xff]  ;;  %v151_v24 = vld [vmem:[%s1914_s2 + $0x20] sm:$0xff]  ;;  %v42_v25 = vld [vmem:[%s1915_s1 + $0x38] sm:$0xff] }
   0x8   :  { %1305 = vmatprep.subr.bf16.mxu1 %v1304_v15  ;;  %1299 = vmatpush3.bf16.msra.mxu0 %v1296_v12  ;;  %v41_v26 = vld [vmem:[%s1915_s1 + $0x30] sm:$0xff]  ;;  %v154_v27 = vld [vmem:[%s1914_s2 + $0x38] sm:$0xff]  ;;  %v44_v29 = vld [vmem:[%s1915_s1 + $0x48] sm:$0xff] }
   0x9   :  { %1307 = vmatpush3.bf16.msra.mxu1 %v1304_v15  ;;  %1301 = vmatprep.subr.bf16.mxu0 %v1300_v21  ;;  %v153_v28 = vld [vmem:[%s1914_s2 + $0x30] sm:$0xff]  ;;  %v43_v30 = vld [vmem:[%s1915_s1 + $0x40] sm:$0xff]  ;;  %v156_v31 = vld [vmem:[%s1914_s2 + $0x48] sm:$0xff] }
   0xa   :  { %68 = vperm.xlu1 %1330, %v38_v5   ;;  %1309 = vmatprep.subr.bf16.mxu1 %v1308_v22  ;;  %v155_v32 = vld [vmem:[%s1914_s2 + $0x40] sm:$0xff]  ;;  %v46_v33 = vld [vmem:[%s1915_s1 + $0x58] sm:$0xff]  ;;  %v45_v34 = vld [vmem:[%s1915_s1 + $0x50] sm:$0xff] }
   0xb   :  { %63 = vperm.xlu0 %1329, %v37_v6   ;;  %v1048_v35 = vld [vmem:[%s1916_s3 + $0x40] sm:$0xff]  ;;  %v1049_v36 = vld [vmem:[%s1916_s3 + $0x48] sm:$0xff]  ;;  %v158_v38 = vld [vmem:[%s1914_s2 + $0x58] sm:$0xff] }
   0xc   :  { %1303 = vmatpush3.bf16.msra.mxu0 %v1300_v21  ;;  %v1068_v37 = vld [vmem:[%s1916_s3 + $0x60] sm:$0xff]  ;;  %v157_v39 = vld [vmem:[%s1914_s2 + $0x50] sm:$0xff]  ;;  %v1312_v40 = vpack.c.bf16 %v1049_v36, %v1048_v35  ;;  %v1069_v41 = vld [vmem:[%s1916_s3 + $0x68] sm:$0xff] }
   0xd   :  { %1311 = vmatpush3.bf16.msra.mxu1 %v1308_v22  ;;  %v1320_v42 = vpack.c.bf16 %v1069_v41, %v1068_v37  ;;  %v48_v43 = vld [vmem:[%s1915_s1 + $0x68] sm:$0xff]  ;;  %v47_v44 = vld [vmem:[%s1915_s1 + $0x60] sm:$0xff]  ;;  %v50_v47 = vld [vmem:[%s1915_s1 + $0x78] sm:$0xff] }
   0xe   :  { %180 = vperm.xlu1 %1330, %v150_v7   ;;  %1313 = vmatprep.subr.bf16.mxu0 %v1312_v40  ;;  %v160_v45 = vld [vmem:[%s1914_s2 + $0x68] sm:$0xff]  ;;  %v159_v46 = vld [vmem:[%s1914_s2 + $0x60] sm:$0xff]  ;;  %v49_v48 = vld [vmem:[%s1915_s1 + $0x70] sm:$0xff] }
   0xf   :  { %175 = vperm.xlu0 %1329, %v149_v8   ;;  %1321 = vmatprep.subr.bf16.mxu1 %v1320_v42  ;;  %v162_v49 = vld [vmem:[%s1914_s2 + $0x78] sm:$0xff]  ;;  %v161_v50 = vld [vmem:[%s1914_s2 + $0x70] sm:$0xff]  ;;  %v19_v51 = vld [vmem:[%s1917_s0] sm:$0xff] }
  0x10   :  { %v20_v55 = vld [vmem:[%s1917_s0 + $0x8] sm:$0xff]  ;;  %v1050_v61 = vld [vmem:[%s1916_s3 + $0x50] sm:$0xff]  ;;  %v1051_v62 = vld [vmem:[%s1916_s3 + $0x58] sm:$0xff] }
  0x11   :  { %v1070_v63 = vld [vmem:[%s1916_s3 + $0x70] sm:$0xff]  ;;  %v1071_v0 = vld [vmem:[%s1916_s3 + $0x78] sm:$0xff]  ;;  %v1316_v7 = vpack.c.bf16 %v1051_v62, %v1050_v61  ;;  %v24_v18 = vld [vmem:[%s1917_s0 + $0x28] sm:$0xff] }
  0x12   :  { %78 = vperm.xlu1 %1330, %v40_v19   ;;  %v22_v3 = vld [vmem:[%s1917_s0 + $0x18] sm:$0xff]  ;;  %v21_v5 = vld [vmem:[%s1917_s0 + $0x10] sm:$0xff]  ;;  %v1324_v8 = vpack.c.bf16 %v1071_v0, %v1070_v63 }
  0x13   :  { %73 = vperm.xlu0 %1329, %v39_v20   ;;  %v23_v20 = vld [vmem:[%s1917_s0 + $0x20] sm:$0xff] }
  0x16   :  { %190 = vperm.xlu1 %1330, %v152_v23  }
  0x17   :  { %185 = vperm.xlu0 %1329, %v151_v24  }
  0x1a   :  { %88 = vperm.xlu1 %1330, %v42_v25  }
  0x1b   :  { %83 = vperm.xlu0 %1329, %v41_v26  }
  0x1e   :  { %200 = vperm.xlu1 %1330, %v154_v27  }
  0x1f   :  { %195 = vperm.xlu0 %1329, %v153_v28  }
  0x22   :  { %98 = vperm.xlu1 %1330, %v44_v29  }
  0x23   :  { %93 = vperm.xlu0 %1329, %v43_v30   ;;  %v26_v30 = vld [vmem:[%s1917_s0 + $0x38] sm:$0xff] }
  0x26   :  { %210 = vperm.xlu1 %1330, %v156_v31  }
  0x27   :  { %205 = vperm.xlu0 %1329, %v155_v32   ;;  %v25_v32 = vld [vmem:[%s1917_s0 + $0x30] sm:$0xff] }
  0x2a   :  { %108 = vperm.xlu1 %1330, %v46_v33  }
  0x2b   :  { %103 = vperm.xlu0 %1329, %v45_v34  }
  0x2e   :  { %220 = vperm.xlu1 %1330, %v158_v38  }
  0x2f   :  { %215 = vperm.xlu0 %1329, %v157_v39  }
  0x32   :  { %118 = vperm.xlu1 %1330, %v48_v43  }
  0x33   :  { %113 = vperm.xlu0 %1329, %v47_v44   ;;  %v27_v44 = vld [vmem:[%s1917_s0 + $0x40] sm:$0xff] }
  0x36   :  { %230 = vperm.xlu1 %1330, %v160_v45  }
  0x37   :  { %225 = vperm.xlu0 %1329, %v159_v46  }
  0x3a   :  { %128 = vperm.xlu1 %1330, %v50_v47  }
  0x3b   :  { %123 = vperm.xlu0 %1329, %v49_v48  }
  0x3e   :  { %240 = vperm.xlu1 %1330, %v162_v49  }
  0x3f   :  { %235 = vperm.xlu0 %1329, %v161_v50  }
  0x81   :  { %v166_v52 = vpop.permute.xlu1 %165 }
  0x82   :  { %v54_v53 = vpop.permute.xlu0 %53 }
  0x83   :  { %v131_v54 = vmul.f32 %v54_v53, %v19_v51 }
  0x85   :  { %v243_v56 = vadd.f32 %v166_v52, %v131_v54  ;;  %v171_v57 = vpop.permute.xlu1 %170  ;;  %v30_v54 = vld [vmem:[%s1917_s0 + $0x58] sm:$0xff] }
  0x86   :  { %v59_v58 = vpop.permute.xlu0 %58 }
  0x87   :  { %v1500_v59 = vmax.f32 %v243_v56, 0.0  ;;  %v132_v60 = vmul.f32 %v59_v58, %v20_v55  ;;  %v29_v56 = vld [vmem:[%s1917_s0 + $0x50] sm:$0xff] }
  0x89   :  { %276 = vst.msk [vmem:[%s1918_s4] sm:$0xff] %vm275_vm0, %v1500_v59  ;;  %v244_v1 = vadd.f32 %v171_v57, %v132_v60  ;;  %1176 = vmatprep.mubr.msk.f32.mxu0 %vm275_vm0, %v1500_v59  ;;  %1208 = vmatprep.mubr.msk.f32.mxu1 %vm275_vm0, %v1500_v59  ;;  %v69_v2 = vpop.permute.xlu1 %68 }
  0x8a   :  { %v64_v4 = vpop.permute.xlu0 %63  ;;  %v134_v9 = vmul.f32 %v69_v2, %v22_v3  ;;  %v32_v3 = vld [vmem:[%s1917_s0 + $0x68] sm:$0xff] }
  0x8b   :  { %v1529_v6 = vmax.f32 %v244_v1, 0.0  ;;  %v133_v10 = vmul.f32 %v64_v4, %v21_v5  ;;  %v31_v5 = vld [vmem:[%s1917_s0 + $0x60] sm:$0xff] }
  0x8d   :  { %277 = vst.msk [vmem:[%s1918_s4 + $0x8] sm:$0xff] %vm275_vm0, %v1529_v6  ;;  %1177 = vmatmul.mubr.msk.f32.vlgmr.msra.gmra.mrb[0].mxu0 %vm275_vm0, %v1529_v6  ;;  %1209 = vmatmul.mubr.msk.f32.vlgmr.msra.gmra.mrb[0].mxu1 %vm275_vm0, %v1529_v6  ;;  %v181_v11 = vpop.permute.xlu1 %180 }
  0x8e   :  { %v176_v12 = vpop.permute.xlu0 %175  ;;  %1315 = vmatpush3.bf16.msra.mxu0 %v1312_v40  ;;  %1323 = vmatpush3.bf16.msra.mxu1 %v1320_v42  ;;  %v246_v13 = vadd.f32 %v181_v11, %v134_v9  ;;  %v28_v42 = vld [vmem:[%s1917_s0 + $0x48] sm:$0xff] }
  0x8f   :  { %v245_v14 = vadd.f32 %v176_v12, %v133_v10  ;;  %1317 = vmatprep.subr.bf16.mxu0 %v1316_v7  ;;  %1325 = vmatprep.subr.bf16.mxu1 %v1324_v8 }
  0x90   :  { %v1540_v15 = vmax.f32 %v246_v13, 0.0 }
  0x91   :  { %v1542_v16 = vmax.f32 %v245_v14, 0.0  ;;  %v79_v17 = vpop.permute.xlu1 %78 }
  0x92   :  { %v74_v19 = vpop.permute.xlu0 %73  ;;  %1319 = vmatpush3.bf16.msra.mxu0 %v1316_v7  ;;  %1327 = vmatpush3.bf16.msra.mxu1 %v1324_v8  ;;  %279 = vst.msk [vmem:[%s1918_s4 + $0x18] sm:$0xff] %vm275_vm0, %v1540_v15  ;;  %v136_v21 = vmul.f32 %v79_v17, %v24_v18  ;;  %v34_v18 = vld [vmem:[%s1917_s0 + $0x78] sm:$0xff] }
  0x93   :  { %278 = vst.msk [vmem:[%s1918_s4 + $0x10] sm:$0xff] %vm275_vm0, %v1542_v16  ;;  %1179 = vmatprep.mubr.msk.f32.mxu0 %vm275_vm0, %v1542_v16  ;;  %1211 = vmatprep.mubr.msk.f32.mxu1 %vm275_vm0, %v1542_v16  ;;  %v135_v22 = vmul.f32 %v74_v19, %v23_v20  ;;  %v33_v20 = vld [vmem:[%s1917_s0 + $0x70] sm:$0xff] }
  0x94   :  { %1180 = vmatmul.mubr.msk.f32.gmra.mrb[2].mxu0 %vm275_vm0, %v1540_v15  ;;  %1212 = vmatmul.mubr.msk.f32.gmra.mrb[2].mxu1 %vm275_vm0, %v1540_v15 }
  0x95   :  { %v191_v23 = vpop.permute.xlu1 %190 }
  0x96   :  { %v186_v24 = vpop.permute.xlu0 %185  ;;  %v248_v25 = vadd.f32 %v191_v23, %v136_v21 }
  0x97   :  { %v247_v26 = vadd.f32 %v186_v24, %v135_v22 }
  0x98   :  { %v1568_v27 = vmax.f32 %v248_v25, 0.0 }
  0x99   :  { %v1570_v28 = vmax.f32 %v247_v26, 0.0  ;;  %v89_v29 = vpop.permute.xlu1 %88 }
  0x9a   :  { %v84_v31 = vpop.permute.xlu0 %83  ;;  %281 = vst.msk [vmem:[%s1918_s4 + $0x28] sm:$0xff] %vm275_vm0, %v1568_v27  ;;  %v138_v33 = vmul.f32 %v89_v29, %v26_v30 }
  0x9b   :  { %280 = vst.msk [vmem:[%s1918_s4 + $0x20] sm:$0xff] %vm275_vm0, %v1570_v28  ;;  %1182 = vmatprep.mubr.msk.f32.mxu0 %vm275_vm0, %v1570_v28  ;;  %1214 = vmatprep.mubr.msk.f32.mxu1 %vm275_vm0, %v1570_v28  ;;  %v137_v34 = vmul.f32 %v84_v31, %v25_v32 }
  0x9c   :  { %1183 = vmatmul.mubr.msk.f32.gmra.mrb[4].mxu0 %vm275_vm0, %v1568_v27  ;;  %1215 = vmatmul.mubr.msk.f32.gmra.mrb[4].mxu1 %vm275_vm0, %v1568_v27 }
  0x9d   :  { %v201_v35 = vpop.permute.xlu1 %200 }
  0x9e   :  { %v196_v36 = vpop.permute.xlu0 %195  ;;  %v250_v37 = vadd.f32 %v201_v35, %v138_v33 }
  0x9f   :  { %v249_v38 = vadd.f32 %v196_v36, %v137_v34 }
  0xa0   :  { %v1596_v39 = vmax.f32 %v250_v37, 0.0 }
  0xa1   :  { %v1598_v40 = vmax.f32 %v249_v38, 0.0  ;;  %v99_v41 = vpop.permute.xlu1 %98 }
  0xa2   :  { %v94_v43 = vpop.permute.xlu0 %93  ;;  %283 = vst.msk [vmem:[%s1918_s4 + $0x38] sm:$0xff] %vm275_vm0, %v1596_v39  ;;  %v140_v45 = vmul.f32 %v99_v41, %v28_v42 }
  0xa3   :  { %282 = vst.msk [vmem:[%s1918_s4 + $0x30] sm:$0xff] %vm275_vm0, %v1598_v40  ;;  %1185 = vmatprep.mubr.msk.f32.mxu0 %vm275_vm0, %v1598_v40  ;;  %1217 = vmatprep.mubr.msk.f32.mxu1 %vm275_vm0, %v1598_v40  ;;  %v139_v46 = vmul.f32 %v94_v43, %v27_v44 }
  0xa4   :  { %1186 = vmatmul.mubr.msk.f32.gmra.mrb[6].mxu0 %vm275_vm0, %v1596_v39  ;;  %1218 = vmatmul.mubr.msk.f32.gmra.mrb[6].mxu1 %vm275_vm0, %v1596_v39 }
  0xa5   :  { %v211_v47 = vpop.permute.xlu1 %210 }
  0xa6   :  { %v206_v48 = vpop.permute.xlu0 %205  ;;  %v252_v49 = vadd.f32 %v211_v47, %v140_v45 }
  0xa7   :  { %v251_v50 = vadd.f32 %v206_v48, %v139_v46 }
  0xa8   :  { %v1624_v51 = vmax.f32 %v252_v49, 0.0 }
  0xa9   :  { %v1626_v52 = vmax.f32 %v251_v50, 0.0  ;;  %v109_v53 = vpop.permute.xlu1 %108 }
  0xaa   :  { %v104_v55 = vpop.permute.xlu0 %103  ;;  %285 = vst.msk [vmem:[%s1918_s4 + $0x48] sm:$0xff] %vm275_vm0, %v1624_v51  ;;  %v142_v57 = vmul.f32 %v109_v53, %v30_v54 }
  0xab   :  { %284 = vst.msk [vmem:[%s1918_s4 + $0x40] sm:$0xff] %vm275_vm0, %v1626_v52  ;;  %1188 = vmatprep.mubr.msk.f32.mxu0 %vm275_vm0, %v1626_v52  ;;  %1220 = vmatprep.mubr.msk.f32.mxu1 %vm275_vm0, %v1626_v52  ;;  %v141_v58 = vmul.f32 %v104_v55, %v29_v56 }
  0xac   :  { %1189 = vmatmul.mubr.msk.f32.gmra.mrb[8].mxu0 %vm275_vm0, %v1624_v51  ;;  %1221 = vmatmul.mubr.msk.f32.gmra.mrb[8].mxu1 %vm275_vm0, %v1624_v51 }
  0xad   :  { %v221_v60 = vpop.permute.xlu1 %220 }
  0xae   :  { %v216_v61 = vpop.permute.xlu0 %215  ;;  %v254_v62 = vadd.f32 %v221_v60, %v142_v57 }
  0xaf   :  { %v253_v63 = vadd.f32 %v216_v61, %v141_v58 }
  0xb0   :  { %v1652_v0 = vmax.f32 %v254_v62, 0.0 }
  0xb1   :  { %v1654_v1 = vmax.f32 %v253_v63, 0.0  ;;  %v119_v2 = vpop.permute.xlu1 %118 }
  0xb2   :  { %v114_v4 = vpop.permute.xlu0 %113  ;;  %287 = vst.msk [vmem:[%s1918_s4 + $0x58] sm:$0xff] %vm275_vm0, %v1652_v0  ;;  %v144_v7 = vmul.f32 %v119_v2, %v32_v3 }
  0xb3   :  { %286 = vst.msk [vmem:[%s1918_s4 + $0x50] sm:$0xff] %vm275_vm0, %v1654_v1  ;;  %1191 = vmatprep.mubr.msk.f32.mxu0 %vm275_vm0, %v1654_v1  ;;  %1223 = vmatprep.mubr.msk.f32.mxu1 %vm275_vm0, %v1654_v1  ;;  %v143_v8 = vmul.f32 %v114_v4, %v31_v5 }
  0xb4   :  { %1192 = vmatmul.mubr.msk.f32.gmra.mrb[10].mxu0 %vm275_vm0, %v1652_v0  ;;  %1224 = vmatmul.mubr.msk.f32.gmra.mrb[10].mxu1 %vm275_vm0, %v1652_v0 }
  0xb5   :  { %v231_v9 = vpop.permute.xlu1 %230 }
  0xb6   :  { %v226_v10 = vpop.permute.xlu0 %225  ;;  %v256_v11 = vadd.f32 %v231_v9, %v144_v7 }
  0xb7   :  { %v255_v12 = vadd.f32 %v226_v10, %v143_v8 }
  0xb8   :  { %v272_v13 = vmax.f32 %v256_v11, 0.0 }
  0xb9   :  { %v271_v14 = vmax.f32 %v255_v12, 0.0  ;;  %v129_v17 = vpop.permute.xlu1 %128 }
  0xba   :  { %v124_v19 = vpop.permute.xlu0 %123  ;;  %289 = vst.msk [vmem:[%s1918_s4 + $0x68] sm:$0xff] %vm275_vm0, %v272_v13  ;;  %v146_v21 = vmul.f32 %v129_v17, %v34_v18 }
  0xbb   :  { %288 = vst.msk [vmem:[%s1918_s4 + $0x60] sm:$0xff] %vm275_vm0, %v271_v14  ;;  %1194 = vmatprep.mubr.msk.f32.mxu0 %vm275_vm0, %v271_v14  ;;  %1226 = vmatprep.mubr.msk.f32.mxu1 %vm275_vm0, %v271_v14  ;;  %v145_v22 = vmul.f32 %v124_v19, %v33_v20 }
  0xbc   :  { %1195 = vmatmul.mubr.msk.f32.gmra.mrb[12].mxu0 %vm275_vm0, %v272_v13  ;;  %1227 = vmatmul.mubr.msk.f32.gmra.mrb[12].mxu1 %vm275_vm0, %v272_v13 }
  0xbd   :  { %v241_v23 = vpop.permute.xlu1 %240 }
  0xbe   :  { %v236_v24 = vpop.permute.xlu0 %235  ;;  %v258_v25 = vadd.f32 %v241_v23, %v146_v21 }
  0xbf   :  { %v257_v26 = vadd.f32 %v236_v24, %v145_v22 }
  0xc0   :  { %v274_v29 = vmax.f32 %v258_v25, 0.0 }
  0xc1   :  { %v273_v30 = vmax.f32 %v257_v26, 0.0 }
  0xc2   :  { %291 = vst.msk [vmem:[%s1918_s4 + $0x78] sm:$0xff] %vm275_vm0, %v274_v29 }
  0xc3   :  { %290 = vst.msk [vmem:[%s1918_s4 + $0x70] sm:$0xff] %vm275_vm0, %v273_v30  ;;  %1197 = vmatprep.mubr.msk.f32.mxu0 %vm275_vm0, %v273_v30  ;;  %1229 = vmatprep.mubr.msk.f32.mxu1 %vm275_vm0, %v273_v30 }
  0xc4   :  { %1198 = vmatmul.mubr.msk.f32.gmra.mrb[14].mxu0 %vm275_vm0, %v274_v29  ;;  %1230 = vmatmul.mubr.msk.f32.gmra.mrb[14].mxu1 %vm275_vm0, %v274_v29 }
  0xc5   :  { %1240 = vmatprep.mubr.msk.f32.mxu0 %vm275_vm0, %v1500_v59  ;;  %1272 = vmatprep.mubr.msk.f32.mxu1 %vm275_vm0, %v1500_v59 }
  0xc8   :  { %1241 = vmatmul.mubr.msk.f32.vlgmr.msra.gmra.mrb[16].mxu0 %vm275_vm0, %v1529_v6  ;;  %1273 = vmatmul.mubr.msk.f32.vlgmr.msra.gmra.mrb[16].mxu1 %vm275_vm0, %v1529_v6 }
  0xc9   :  { %1243 = vmatprep.mubr.msk.f32.mxu0 %vm275_vm0, %v1542_v16  ;;  %1275 = vmatprep.mubr.msk.f32.mxu1 %vm275_vm0, %v1542_v16 }
  0xcc   :  { %1244 = vmatmul.mubr.msk.f32.gmra.mrb[18].mxu0 %vm275_vm0, %v1540_v15  ;;  %1276 = vmatmul.mubr.msk.f32.gmra.mrb[18].mxu1 %vm275_vm0, %v1540_v15 }
  0xcd   :  { %1246 = vmatprep.mubr.msk.f32.mxu0 %vm275_vm0, %v1570_v28  ;;  %1278 = vmatprep.mubr.msk.f32.mxu1 %vm275_vm0, %v1570_v28 }
  0xd0   :  { %1247 = vmatmul.mubr.msk.f32.gmra.mrb[20].mxu0 %vm275_vm0, %v1568_v27  ;;  %1279 = vmatmul.mubr.msk.f32.gmra.mrb[20].mxu1 %vm275_vm0, %v1568_v27 }
  0xd1   :  { %1249 = vmatprep.mubr.msk.f32.mxu0 %vm275_vm0, %v1598_v40  ;;  %1281 = vmatprep.mubr.msk.f32.mxu1 %vm275_vm0, %v1598_v40 }
  0xd4   :  { %1250 = vmatmul.mubr.msk.f32.gmra.mrb[22].mxu0 %vm275_vm0, %v1596_v39  ;;  %1282 = vmatmul.mubr.msk.f32.gmra.mrb[22].mxu1 %vm275_vm0, %v1596_v39 }
  0xd5   :  { %1252 = vmatprep.mubr.msk.f32.mxu0 %vm275_vm0, %v1626_v52  ;;  %1284 = vmatprep.mubr.msk.f32.mxu1 %vm275_vm0, %v1626_v52 }
  0xd8   :  { %1253 = vmatmul.mubr.msk.f32.gmra.mrb[24].mxu0 %vm275_vm0, %v1624_v51  ;;  %1285 = vmatmul.mubr.msk.f32.gmra.mrb[24].mxu1 %vm275_vm0, %v1624_v51 }
  0xd9   :  { %1255 = vmatprep.mubr.msk.f32.mxu0 %vm275_vm0, %v1654_v1  ;;  %1287 = vmatprep.mubr.msk.f32.mxu1 %vm275_vm0, %v1654_v1 }
  0xdc   :  { %1256 = vmatmul.mubr.msk.f32.gmra.mrb[26].mxu0 %vm275_vm0, %v1652_v0  ;;  %1288 = vmatmul.mubr.msk.f32.gmra.mrb[26].mxu1 %vm275_vm0, %v1652_v0 }
  0xdd   :  { %1258 = vmatprep.mubr.msk.f32.mxu0 %vm275_vm0, %v271_v14  ;;  %1290 = vmatprep.mubr.msk.f32.mxu1 %vm275_vm0, %v271_v14 }
  0xe0   :  { %1259 = vmatmul.mubr.msk.f32.gmra.mrb[28].mxu0 %vm275_vm0, %v272_v13  ;;  %1291 = vmatmul.mubr.msk.f32.gmra.mrb[28].mxu1 %vm275_vm0, %v272_v13 }
  0xe1   :  { %1261 = vmatprep.mubr.msk.f32.mxu0 %vm275_vm0, %v273_v30  ;;  %1293 = vmatprep.mubr.msk.f32.mxu1 %vm275_vm0, %v273_v30 }
  0xe4   :  { %1262 = vmatmul.mubr.msk.f32.gmra.mrb[30].mxu0 %vm275_vm0, %v274_v29  ;;  %1294 = vmatmul.mubr.msk.f32.gmra.mrb[30].mxu1 %vm275_vm0, %v274_v29 }
 0x160   :  { %v1178_v59 = vpop.f32.mrb[0].mxu0  ;;  %v1210_v6 = vpop.f32.mrb[0].mxu1 }
 0x161   :  { %v640_v15 = vmax.f32 %v1178_v59, %v1210_v6  ;;  %v410_v16 = vpop.f32.mrb[1].mxu0  ;;  %v560_v27 = vpop.f32.mrb[1].mxu1 }
 0x162   :  { %v639_v28 = vmax.f32 %v410_v16, %v560_v27 }
 0x167   :  { %v1181_v31 = vpop.f32.mrb[2].mxu0  ;;  %v1213_v32 = vpop.f32.mrb[2].mxu1 }
 0x168   :  { %v642_v33 = vmax.f32 %v1181_v31, %v1213_v32  ;;  %v420_v34 = vpop.f32.mrb[3].mxu0  ;;  %v570_v35 = vpop.f32.mrb[3].mxu1 }
 0x169   :  { %v641_v36 = vmax.f32 %v420_v34, %v570_v35 }
 0x16f   :  { %v1184_v37 = vpop.f32.mrb[4].mxu0  ;;  %v1216_v38 = vpop.f32.mrb[4].mxu1 }
 0x170   :  { %v644_v39 = vmax.f32 %v1184_v37, %v1216_v38  ;;  %v430_v40 = vpop.f32.mrb[5].mxu0  ;;  %v580_v41 = vpop.f32.mrb[5].mxu1 }
 0x171   :  { %v643_v42 = vmax.f32 %v430_v40, %v580_v41 }
 0x177   :  { %v1766_v43 = vpop.f32.mrb[6].mxu0  ;;  %v1768_v44 = vpop.f32.mrb[6].mxu1 }
 0x178   :  { %v646_v45 = vmax.f32 %v1766_v43, %v1768_v44  ;;  %v1772_v46 = vpop.f32.mrb[7].mxu0  ;;  %v1774_v47 = vpop.f32.mrb[7].mxu1 }
 0x179   :  { %v645_v48 = vmax.f32 %v1772_v46, %v1774_v47 }
 0x17f   :  { %v1778_v49 = vpop.f32.mrb[8].mxu0  ;;  %v1780_v50 = vpop.f32.mrb[8].mxu1 }
 0x180   :  { %v648_v51 = vmax.f32 %v1778_v49, %v1780_v50  ;;  %v1784_v52 = vpop.f32.mrb[9].mxu0  ;;  %v1786_v53 = vpop.f32.mrb[9].mxu1 }
 0x181   :  { %v647_v54 = vmax.f32 %v1784_v52, %v1786_v53 }
 0x187   :  { %v1790_v55 = vpop.f32.mrb[10].mxu0  ;;  %v1792_v56 = vpop.f32.mrb[10].mxu1 }
 0x188   :  { %v650_v57 = vmax.f32 %v1790_v55, %v1792_v56  ;;  %v1796_v58 = vpop.f32.mrb[11].mxu0  ;;  %v1798_v60 = vpop.f32.mrb[11].mxu1 }
 0x189   :  { %v649_v61 = vmax.f32 %v1796_v58, %v1798_v60 }
 0x18f   :  { %v1802_v62 = vpop.f32.mrb[12].mxu0  ;;  %v1804_v63 = vpop.f32.mrb[12].mxu1 }
 0x190   :  { %v652_v0 = vmax.f32 %v1802_v62, %v1804_v63  ;;  %v1808_v1 = vpop.f32.mrb[13].mxu0  ;;  %v1810_v2 = vpop.f32.mrb[13].mxu1 }
 0x191   :  { %v651_v3 = vmax.f32 %v1808_v1, %v1810_v2 }
 0x197   :  { %v1814_v4 = vpop.f32.mrb[14].mxu0  ;;  %v1816_v5 = vpop.f32.mrb[14].mxu1 }
 0x198   :  { %v654_v7 = vmax.f32 %v1814_v4, %v1816_v5  ;;  %v1820_v8 = vpop.f32.mrb[15].mxu0  ;;  %v1822_v9 = vpop.f32.mrb[15].mxu1 }
 0x199   :  { %v653_v10 = vmax.f32 %v1820_v8, %v1822_v9 }
 0x19b   :  { %v1242_v11 = vpop.f32.mrb[16].mxu0  ;;  %v1274_v12 = vpop.f32.mrb[16].mxu1 }
 0x19c   :  { %v806_v13 = vmax.f32 %v640_v15, %v1242_v11  ;;  %v726_v14 = vpop.f32.mrb[17].mxu0  ;;  %v892_v17 = vpop.f32.mrb[17].mxu1 }
 0x19d   :  { %v805_v18 = vmax.f32 %v639_v28, %v726_v14 }
 0x19e   :  { %v972_v19 = vmax.f32 %v806_v13, %v1274_v12 }
 0x19f   :  { %v971_v20 = vmax.f32 %v805_v18, %v892_v17  ;;  %v1245_v21 = vpop.f32.mrb[18].mxu0  ;;  %v1277_v22 = vpop.f32.mrb[18].mxu1 }
 0x1a0   :  { %989 = vst.msk [vmem:[%s1919_s5 + $0x8] sm:$0xff] %vm987_vm1, %v972_v19  ;;  %v808_v23 = vmax.f32 %v642_v33, %v1245_v21  ;;  %v736_v24 = vpop.f32.mrb[19].mxu0  ;;  %v902_v25 = vpop.f32.mrb[19].mxu1 }
 0x1a1   :  { %988 = vst.msk [vmem:[%s1919_s5] sm:$0xff] %vm987_vm1, %v971_v20  ;;  %v807_v26 = vmax.f32 %v641_v36, %v736_v24 }
 0x1a2   :  { %v974_v29 = vmax.f32 %v808_v23, %v1277_v22 }
 0x1a3   :  { %v973_v30 = vmax.f32 %v807_v26, %v902_v25  ;;  %v1248_v59 = vpop.f32.mrb[20].mxu0  ;;  %v1280_v6 = vpop.f32.mrb[20].mxu1 }
 0x1a4   :  { %991 = vst.msk [vmem:[%s1919_s5 + $0x18] sm:$0xff] %vm987_vm1, %v974_v29  ;;  %v810_v15 = vmax.f32 %v644_v39, %v1248_v59  ;;  %v746_v16 = vpop.f32.mrb[21].mxu0  ;;  %v912_v27 = vpop.f32.mrb[21].mxu1 }
 0x1a5   :  { %990 = vst.msk [vmem:[%s1919_s5 + $0x10] sm:$0xff] %vm987_vm1, %v973_v30  ;;  %v809_v28 = vmax.f32 %v643_v42, %v746_v16 }
 0x1a6   :  { %v976_v31 = vmax.f32 %v810_v15, %v1280_v6 }
 0x1a7   :  { %v975_v32 = vmax.f32 %v809_v28, %v912_v27  ;;  %v1251_v33 = vpop.f32.mrb[22].mxu0  ;;  %v1283_v34 = vpop.f32.mrb[22].mxu1 }
 0x1a8   :  { %993 = vst.msk [vmem:[%s1919_s5 + $0x28] sm:$0xff] %vm987_vm1, %v976_v31  ;;  %v812_v35 = vmax.f32 %v646_v45, %v1251_v33  ;;  %v756_v36 = vpop.f32.mrb[23].mxu0  ;;  %v922_v37 = vpop.f32.mrb[23].mxu1 }
 0x1a9   :  { %992 = vst.msk [vmem:[%s1919_s5 + $0x20] sm:$0xff] %vm987_vm1, %v975_v32  ;;  %v811_v38 = vmax.f32 %v645_v48, %v756_v36 }
 0x1aa   :  { %v978_v39 = vmax.f32 %v812_v35, %v1283_v34 }
 0x1ab   :  { %v977_v40 = vmax.f32 %v811_v38, %v922_v37  ;;  %v1254_v41 = vpop.f32.mrb[24].mxu0  ;;  %v1286_v42 = vpop.f32.mrb[24].mxu1 }
 0x1ac   :  { %995 = vst.msk [vmem:[%s1919_s5 + $0x38] sm:$0xff] %vm987_vm1, %v978_v39  ;;  %v814_v43 = vmax.f32 %v648_v51, %v1254_v41  ;;  %v766_v44 = vpop.f32.mrb[25].mxu0  ;;  %v932_v45 = vpop.f32.mrb[25].mxu1 }
 0x1ad   :  { %994 = vst.msk [vmem:[%s1919_s5 + $0x30] sm:$0xff] %vm987_vm1, %v977_v40  ;;  %v813_v46 = vmax.f32 %v647_v54, %v766_v44 }
 0x1ae   :  { %v980_v47 = vmax.f32 %v814_v43, %v1286_v42 }
 0x1af   :  { %v979_v48 = vmax.f32 %v813_v46, %v932_v45  ;;  %v1257_v11 = vpop.f32.mrb[26].mxu0  ;;  %v1289_v12 = vpop.f32.mrb[26].mxu1 }
 0x1b0   :  { %997 = vst.msk [vmem:[%s1919_s5 + $0x48] sm:$0xff] %vm987_vm1, %v980_v47  ;;  %v816_v49 = vmax.f32 %v650_v57, %v1257_v11  ;;  %v776_v50 = vpop.f32.mrb[27].mxu0  ;;  %v942_v51 = vpop.f32.mrb[27].mxu1 }
 0x1b1   :  { %996 = vst.msk [vmem:[%s1919_s5 + $0x40] sm:$0xff] %vm987_vm1, %v979_v48  ;;  %v815_v52 = vmax.f32 %v649_v61, %v776_v50 }
 0x1b2   :  { %v982_v53 = vmax.f32 %v816_v49, %v1289_v12 }
 0x1b3   :  { %v981_v54 = vmax.f32 %v815_v52, %v942_v51  ;;  %v1260_v13 = vpop.f32.mrb[28].mxu0  ;;  %v1292_v14 = vpop.f32.mrb[28].mxu1 }
 0x1b4   :  { %999 = vst.msk [vmem:[%s1919_s5 + $0x58] sm:$0xff] %vm987_vm1, %v982_v53  ;;  %v818_v55 = vmax.f32 %v652_v0, %v1260_v13  ;;  %v786_v56 = vpop.f32.mrb[29].mxu0  ;;  %v952_v57 = vpop.f32.mrb[29].mxu1 }
 0x1b5   :  { %998 = vst.msk [vmem:[%s1919_s5 + $0x50] sm:$0xff] %vm987_vm1, %v981_v54  ;;  %v817_v58 = vmax.f32 %v651_v3, %v786_v56 }
 0x1b6   :  { %v984_v60 = vmax.f32 %v818_v55, %v1292_v14 }
 0x1b7   :  { %v983_v61 = vmax.f32 %v817_v58, %v952_v57  ;;  %v1263_v17 = vpop.f32.mrb[30].mxu0  ;;  %v1295_v18 = vpop.f32.mrb[30].mxu1 }
 0x1b8   :  { %1001 = vst.msk [vmem:[%s1919_s5 + $0x68] sm:$0xff] %vm987_vm1, %v984_v60  ;;  %v820_v62 = vmax.f32 %v654_v7, %v1263_v17  ;;  %v796_v63 = vpop.f32.mrb[31].mxu0  ;;  %v962_v0 = vpop.f32.mrb[31].mxu1 }
 0x1b9   :  { %1000 = vst.msk [vmem:[%s1919_s5 + $0x60] sm:$0xff] %vm987_vm1, %v983_v61  ;;  %v819_v1 = vmax.f32 %v653_v10, %v796_v63 }
 0x1ba   :  { %v986_v2 = vmax.f32 %v820_v62, %v1295_v18 }
 0x1bb   :  { %v985_v3 = vmax.f32 %v819_v1, %v962_v0 }
 0x1bc   :  { %1003 = vst.msk [vmem:[%s1919_s5 + $0x78] sm:$0xff] %vm987_vm1, %v986_v2 }
 0x1bd   :  { %1002 = vst.msk [vmem:[%s1919_s5 + $0x70] sm:$0xff] %vm987_vm1, %v985_v3 }

</bundles_post_ra>
